<compile_context>
chip_gen: v5e
topology: v5e:2x2
jax: 0.10.0
libtpu: 0.0.40
codegen_flags: <defaults>
</compile_context>

<pallas_src>
import functools

import jax
import jax.numpy as jnp
from jax import lax
from jax.experimental import pallas as pl
from jax.experimental.pallas import tpu as pltpu


def _round_up(v, m):
    return (v + m - 1) // m * m


# ------------------------------ Pallas kernel -------------------------------

def _conv_bn_relu_kernel(x_ref, w_ref, gb_ref, o_ref, *,
                         kh_size, kw_size, pad_w, img_w, seg, front,
                         eps, inv_count):
    """Implicit-GEMM conv + BatchNorm (batch stats, biased var) + ReLU in VMEM.

    x_ref:  (C_in, FRONT + N*SEG + TAIL)  compute dtype; H-padded input, per
            image spatially flattened into SEG-lane zero-padded segments.
    w_ref:  (KH*KW, C_out, C_in)          compute dtype; conv taps.
    gb_ref: (C_out, 2)                    f32; [:, 0] = gamma, [:, 1] = beta.
    o_ref:  (N, C_out, OH*OW)             f32; NCHW-flattened output.
    """
    n_batch, c_out, ohw = o_ref.shape
    c_in = x_ref.shape[0]
    nl = n_batch * seg

    xfull = x_ref[...]                                    # one aligned load

    # Lane bookkeeping.  SEG % W == 0, so (lane % W) is the image column for
    # every batch segment; lanes with (lane % SEG) >= OH*OW are the per-image
    # junk tail and are forced to zero so the stats are one full reduction.
    lane = lax.broadcasted_iota(jnp.int32, (c_in, nl), 1)
    col = lane % img_w
    in_image = (lane % seg) < ohw
    masks = []
    for kw in range(kw_size):
        dw = kw - pad_w                                   # W-direction offset
        m = in_image
        if dw > 0:
            m = jnp.logical_and(m, col < img_w - dw)
        elif dw < 0:
            m = jnp.logical_and(m, col >= -dw)
        masks.append(m)

    # KH*KW shifted dots accumulated in f32 ("implicit GEMM"); the batch is
    # folded into the lane dim -> one MXU operand per tap, no per-batch loop.
    acc = jnp.zeros((c_out, nl), jnp.float32)
    for kh in range(kh_size):
        for kw in range(kw_size):
            shift = kh * img_w + (kw - pad_w)             # static lane shift
            xop = xfull[:, front + shift:front + shift + nl]
            xop = jnp.where(masks[kw], xop, 0)
            wk = w_ref[kh * kw_size + kw]                 # (C_out, C_in)
            acc = acc + jnp.dot(wk, xop, preferred_element_type=jnp.float32)

    # BatchNorm training-mode statistics over (N, OH, OW), biased variance
    # (exactly nn.BatchNorm2d in train mode).  Junk lanes are exactly zero.
    s1 = jnp.sum(acc, axis=1, keepdims=True)              # (C_out, 1)
    s2 = jnp.sum(acc * acc, axis=1, keepdims=True)
    mean = s1 * inv_count
    var = jnp.maximum(s2 * inv_count - mean * mean, 0.0)  # clamp cancellation
    inv_std = lax.rsqrt(var + eps)
    scale = gb_ref[:, 0:1] * inv_std                      # (C_out, 1)
    shift_bn = gb_ref[:, 1:2] - mean * scale

    # One broadcast / fused normalize + ReLU over the whole result, then
    # lane-dense (128-aligned) per-image stores.
    z = jnp.maximum(acc * scale + shift_bn, 0.0)
    for n in range(n_batch):
        o_ref[n] = z[:, n * seg:n * seg + ohw].astype(o_ref.dtype)


# ------------------------------ Host wrapper --------------------------------

def conv_block_forward(x, weight, bias, gamma, beta, *, padding=1, eps=1e-5,
                       compute_dtype=jnp.float32):
    """x: NCHW f32. weight: (C_out, C_in, KH, KW). Returns NCHW f32."""
    # Conv bias is exactly cancelled by the BatchNorm mean subtraction
    # (variance is shift-invariant), so it never needs to reach the kernel.
    del bias

    N, C_in, H, W = x.shape
    C_out, _, KH, KW = weight.shape
    pad = int(padding)
    OH = H + 2 * pad - KH + 1
    OW = W + 2 * pad - KW + 1
    assert OW == W, "kernel assumes a 'same'-width conv: 2*padding == KW - 1"
    OHW = OH * OW

    Hp = H + 2 * pad
    seg_raw = Hp * W
    SEG = _round_up(seg_raw, 128)          # 128-aligned per-image segments
    assert SEG % W == 0, "need SEG % W == 0 for the in-kernel column masks"
    FRONT, TAIL = 128, 128                 # room for the +/- tap shifts
    NL = N * SEG
    assert pad <= FRONT and (KH - 1) * W + (KW - 1 - pad) <= TAIL

    # Single H-padded, flattened copy of the input (~1x data; the old 9x
    # im2col HBM blow-up and its stack/reshape chain are gone).
    xh = jnp.pad(x, ((0, 0), (0, 0), (pad, pad), (0, 0)))          # (N,C,Hp,W)
    xf = xh.reshape(N, C_in, seg_raw)
    xf = jnp.pad(xf, ((0, 0), (0, 0), (0, SEG - seg_raw)))
    xf = jnp.transpose(xf, (1, 0, 2)).reshape(C_in, NL)            # (C, N*SEG)
    xk = jnp.pad(xf, ((0, 0), (FRONT, TAIL))).astype(compute_dtype)

    wk = jnp.transpose(weight, (2, 3, 0, 1)).reshape(KH * KW, C_out, C_in)
    wk = wk.astype(compute_dtype)
    gb = jnp.stack([gamma, beta], axis=1).astype(jnp.float32)      # (C_out, 2)

    kernel = functools.partial(
        _conv_bn_relu_kernel,
        kh_size=KH, kw_size=KW, pad_w=pad, img_w=W, seg=SEG, front=FRONT,
        eps=float(eps), inv_count=1.0 / float(N * OHW))

    out_flat = pl.pallas_call(
        kernel,
        out_shape=jax.ShapeDtypeStruct((N, C_out, OHW), jnp.float32),
        grid=(1,),   # whole problem fits VMEM -> single step, single launch
        in_specs=[
            pl.BlockSpec((C_in, FRONT + NL + TAIL), lambda i: (0, 0)),
            pl.BlockSpec((KH * KW, C_out, C_in), lambda i: (0, 0, 0)),
            pl.BlockSpec((C_out, 2), lambda i: (0, 0)),
        ],
        out_specs=pl.BlockSpec((N, C_out, OHW), lambda i: (0, 0, 0)),
        compiler_params=pltpu.CompilerParams(
            dimension_semantics=("arbitrary",)),
    )(xk, wk, gb)

    return out_flat.reshape(N, C_out, OH, OW)


# ------------------------------- Reference ----------------------------------

def conv_block_reference(x, weight, bias, gamma, beta, *, padding=1, eps=1e-5):
    y = lax.conv_general_dilated(
        x, weight, window_strides=(1, 1),
        padding=[(padding, padding), (padding, padding)],
        dimension_numbers=("NCHW", "OIHW", "NCHW"),
        precision=lax.Precision.HIGHEST,
    ) + bias.reshape(1, -1, 1, 1)
    mean = jnp.mean(y, axis=(0, 2, 3), keepdims=True)
    var = jnp.mean((y - mean) ** 2, axis=(0, 2, 3), keepdims=True)   # biased
    yn = (y - mean) * lax.rsqrt(var + eps)
    return jnp.maximum(yn * gamma.reshape(1, -1, 1, 1)
                       + beta.reshape(1, -1, 1, 1), 0.0)


# --------------------------------- Main --------------------------------------

if __name__ == "__main__":
    # ConvBlock(in_channels=4, out_channels=8, kernel_size=3, padding=1)
    N, C_in, H, W = 2, 4, 16, 16
    C_out, KH, KW = 8, 3, 3

    key = jax.random.PRNGKey(0)
    kx, kw_, kb, kg, kbt = jax.random.split(key, 5)

    x = jax.random.normal(kx, (N, C_in, H, W), dtype=jnp.float32)
    weight = jax.random.normal(kw_, (C_out, C_in, KH, KW), dtype=jnp.float32) * 0.1
    bias = jax.random.normal(kb, (C_out,), dtype=jnp.float32) * 0.1
    gamma = 1.0 + 0.1 * jax.random.normal(kg, (C_out,), dtype=jnp.float32)
    beta = 0.1 * jax.random.normal(kbt, (C_out,), dtype=jnp.float32)

    ref = conv_block_reference(x, weight, bias, gamma, beta, padding=1)

    # f32 path (matches the PyTorch module's numerics).
    out = conv_block_forward(x, weight, bias, gamma, beta, padding=1)
    out = jax.block_until_ready(out)
    assert out.shape == (N, C_out, H, W)
    assert jnp.allclose(out, ref, rtol=1e-4, atol=1e-4), (
        float(jnp.max(jnp.abs(out - ref))))

    # bf16 MXU-input path (perf-review item): stats/normalize stay f32, so the
    # error stays small but the tolerance is loosened accordingly.
    out_bf16 = conv_block_forward(x, weight, bias, gamma, beta, padding=1,
                                  compute_dtype=jnp.bfloat16)
    out_bf16 = jax.block_until_ready(out_bf16)
    assert jnp.allclose(out_bf16, ref, rtol=5e-2, atol=5e-2), (
        float(jnp.max(jnp.abs(out_bf16 - ref))))

    print("KERNEL_OK")
</pallas_src>

<mosaic_0001>
module attributes {stable_mosaic.version = 11 : i64} {
  func.func @_conv_bn_relu_kernel(%arg0: i32, %arg1: memref<4x1024xf32, #tpu.memory_space<vmem>>, %arg2: memref<9x8x4xf32, #tpu.memory_space<vmem>>, %arg3: memref<8x2xf32, #tpu.memory_space<vmem>>, %arg4: memref<2x8x256xf32, #tpu.memory_space<vmem>>) attributes {dimension_semantics = [#tpu.dimension_semantics<arbitrary>], iteration_bounds = array<i64: 1>, scalar_prefetch = 0 : i64, scratch_operands = 0 : i64, tpu.core_type = #tpu.core_type<tc>, window_params = [{pipeline_mode = #tpu.pipeline_mode<synchronous>, transform_indices = @transform_0, window_bounds = array<i64: 4, 1024>}, {pipeline_mode = #tpu.pipeline_mode<synchronous>, transform_indices = @transform_1, window_bounds = array<i64: 9, 8, 4>}, {pipeline_mode = #tpu.pipeline_mode<synchronous>, transform_indices = @transform_2, window_bounds = array<i64: 8, 2>}, {pipeline_mode = #tpu.pipeline_mode<synchronous>, transform_indices = @transform_3, window_bounds = array<i64: 2, 8, 256>}]} {
    %c0 = arith.constant 0 : index
    %c0_0 = arith.constant 0 : index
    %0 = vector.load %arg1[%c0, %c0_0] : memref<4x1024xf32, #tpu.memory_space<vmem>>, vector<4x1024xf32>
    %1 = tpu.iota {dimensions = array<i32: 1>} : vector<4x768xi32>
    %c16_i32 = arith.constant 16 : i32
    %c0_i32 = arith.constant 0 : i32
    %2 = arith.cmpi eq, %c16_i32, %c0_i32 : i32
    %c1_i32 = arith.constant 1 : i32
    %3 = arith.select %2, %c1_i32, %c16_i32 : i32
    %4 = vector.broadcast %3 : i32 to vector<4x768xi32>
    %5 = arith.remsi %1, %4 : vector<4x768xi32>
    %c0_i32_1 = arith.constant 0 : i32
    %6 = vector.broadcast %c0_i32_1 : i32 to vector<4x768xi32>
    %7 = arith.cmpi ne, %5, %6 : vector<4x768xi32>
    %c0_i32_2 = arith.constant 0 : i32
    %8 = vector.broadcast %c0_i32_2 : i32 to vector<4x768xi32>
    %9 = arith.cmpi slt, %5, %8 : vector<4x768xi32>
    %c0_i32_3 = arith.constant 0 : i32
    %10 = arith.cmpi slt, %3, %c0_i32_3 : i32
    %11 = vector.broadcast %10 : i1 to vector<4x768xi1>
    %12 = vector.broadcast %11 : vector<4x768xi1> to vector<4x768xi1>
    %13 = arith.xori %9, %12 : vector<4x768xi1>
    %14 = arith.andi %13, %7 : vector<4x768xi1>
    %15 = vector.broadcast %3 : i32 to vector<4x768xi32>
    %16 = arith.addi %5, %15 : vector<4x768xi32>
    %17 = arith.select %14, %16, %5 : vector<4x768xi1>, vector<4x768xi32>
    %c384_i32 = arith.constant 384 : i32
    %c0_i32_4 = arith.constant 0 : i32
    %18 = arith.cmpi eq, %c384_i32, %c0_i32_4 : i32
    %c1_i32_5 = arith.constant 1 : i32
    %19 = arith.select %18, %c1_i32_5, %c384_i32 : i32
    %20 = vector.broadcast %19 : i32 to vector<4x768xi32>
    %21 = arith.remsi %1, %20 : vector<4x768xi32>
    %c0_i32_6 = arith.constant 0 : i32
    %22 = vector.broadcast %c0_i32_6 : i32 to vector<4x768xi32>
    %23 = arith.cmpi ne, %21, %22 : vector<4x768xi32>
    %c0_i32_7 = arith.constant 0 : i32
    %24 = vector.broadcast %c0_i32_7 : i32 to vector<4x768xi32>
    %25 = arith.cmpi slt, %21, %24 : vector<4x768xi32>
    %c0_i32_8 = arith.constant 0 : i32
    %26 = arith.cmpi slt, %19, %c0_i32_8 : i32
    %27 = vector.broadcast %26 : i1 to vector<4x768xi1>
    %28 = vector.broadcast %27 : vector<4x768xi1> to vector<4x768xi1>
    %29 = arith.xori %25, %28 : vector<4x768xi1>
    %30 = arith.andi %29, %23 : vector<4x768xi1>
    %31 = vector.broadcast %19 : i32 to vector<4x768xi32>
    %32 = arith.addi %21, %31 : vector<4x768xi32>
    %33 = arith.select %30, %32, %21 : vector<4x768xi1>, vector<4x768xi32>
    %c256_i32 = arith.constant 256 : i32
    %34 = vector.broadcast %c256_i32 : i32 to vector<4x768xi32>
    %35 = arith.cmpi slt, %33, %34 : vector<4x768xi32>
    %c1_i32_9 = arith.constant 1 : i32
    %36 = vector.broadcast %c1_i32_9 : i32 to vector<4x768xi32>
    %37 = arith.cmpi sge, %17, %36 : vector<4x768xi32>
    %38 = arith.andi %35, %37 : vector<4x768xi1>
    %c15_i32 = arith.constant 15 : i32
    %39 = vector.broadcast %c15_i32 : i32 to vector<4x768xi32>
    %40 = arith.cmpi slt, %17, %39 : vector<4x768xi32>
    %41 = arith.andi %35, %40 : vector<4x768xi1>
    %cst = arith.constant 0.000000e+00 : f32
    %42 = vector.broadcast %cst : f32 to vector<8x768xf32>
    %43 = vector.extract_strided_slice %0 {offsets = [0, 127], sizes = [4, 768], strides = [1, 1]} : vector<4x1024xf32> to vector<4x768xf32>
    %c0_i32_10 = arith.constant 0 : i32
    %44 = arith.sitofp %c0_i32_10 : i32 to f32
    %45 = vector.broadcast %44 : f32 to vector<4x768xf32>
    %46 = arith.select %38, %43, %45 : vector<4x768xi1>, vector<4x768xf32>
    %c0_11 = arith.constant 0 : index
    %c0_12 = arith.constant 0 : index
    %c0_13 = arith.constant 0 : index
    %47 = vector.load %arg2[%c0_11, %c0_12, %c0_13] : memref<9x8x4xf32, #tpu.memory_space<vmem>>, vector<1x8x4xf32>
    %48 = vector.shape_cast %47 : vector<1x8x4xf32> to vector<8x4xf32>
    %cst_14 = arith.constant dense<0.000000e+00> : vector<8x768xf32>
    %49 = tpu.matmul %48, %46, %cst_14 {dimension_numbers = #tpu.dot_dimension_numbers<[1], [0], [0], [1], [0, 0, 1, 1], [], []>} : vector<8x4xf32>, vector<4x768xf32>, vector<8x768xf32> -> vector<8x768xf32>
    %50 = arith.addf %42, %49 : vector<8x768xf32>
    %51 = vector.extract_strided_slice %0 {offsets = [0, 128], sizes = [4, 768], strides = [1, 1]} : vector<4x1024xf32> to vector<4x768xf32>
    %c0_i32_15 = arith.constant 0 : i32
    %52 = arith.sitofp %c0_i32_15 : i32 to f32
    %53 = vector.broadcast %52 : f32 to vector<4x768xf32>
    %54 = arith.select %35, %51, %53 : vector<4x768xi1>, vector<4x768xf32>
    %c1 = arith.constant 1 : index
    %c0_16 = arith.constant 0 : index
    %c0_17 = arith.constant 0 : index
    %55 = vector.load %arg2[%c1, %c0_16, %c0_17] : memref<9x8x4xf32, #tpu.memory_space<vmem>>, vector<1x8x4xf32>
    %56 = vector.shape_cast %55 : vector<1x8x4xf32> to vector<8x4xf32>
    %cst_18 = arith.constant dense<0.000000e+00> : vector<8x768xf32>
    %57 = tpu.matmul %56, %54, %cst_18 {dimension_numbers = #tpu.dot_dimension_numbers<[1], [0], [0], [1], [0, 0, 1, 1], [], []>} : vector<8x4xf32>, vector<4x768xf32>, vector<8x768xf32> -> vector<8x768xf32>
    %58 = arith.addf %50, %57 : vector<8x768xf32>
    %59 = vector.extract_strided_slice %0 {offsets = [0, 129], sizes = [4, 768], strides = [1, 1]} : vector<4x1024xf32> to vector<4x768xf32>
    %c0_i32_19 = arith.constant 0 : i32
    %60 = arith.sitofp %c0_i32_19 : i32 to f32
    %61 = vector.broadcast %60 : f32 to vector<4x768xf32>
    %62 = arith.select %41, %59, %61 : vector<4x768xi1>, vector<4x768xf32>
    %c2 = arith.constant 2 : index
    %c0_20 = arith.constant 0 : index
    %c0_21 = arith.constant 0 : index
    %63 = vector.load %arg2[%c2, %c0_20, %c0_21] : memref<9x8x4xf32, #tpu.memory_space<vmem>>, vector<1x8x4xf32>
    %64 = vector.shape_cast %63 : vector<1x8x4xf32> to vector<8x4xf32>
    %cst_22 = arith.constant dense<0.000000e+00> : vector<8x768xf32>
    %65 = tpu.matmul %64, %62, %cst_22 {dimension_numbers = #tpu.dot_dimension_numbers<[1], [0], [0], [1], [0, 0, 1, 1], [], []>} : vector<8x4xf32>, vector<4x768xf32>, vector<8x768xf32> -> vector<8x768xf32>
    %66 = arith.addf %58, %65 : vector<8x768xf32>
    %67 = vector.extract_strided_slice %0 {offsets = [0, 143], sizes = [4, 768], strides = [1, 1]} : vector<4x1024xf32> to vector<4x768xf32>
    %c0_i32_23 = arith.constant 0 : i32
    %68 = arith.sitofp %c0_i32_23 : i32 to f32
    %69 = vector.broadcast %68 : f32 to vector<4x768xf32>
    %70 = arith.select %38, %67, %69 : vector<4x768xi1>, vector<4x768xf32>
    %c3 = arith.constant 3 : index
    %c0_24 = arith.constant 0 : index
    %c0_25 = arith.constant 0 : index
    %71 = vector.load %arg2[%c3, %c0_24, %c0_25] : memref<9x8x4xf32, #tpu.memory_space<vmem>>, vector<1x8x4xf32>
    %72 = vector.shape_cast %71 : vector<1x8x4xf32> to vector<8x4xf32>
    %cst_26 = arith.constant dense<0.000000e+00> : vector<8x768xf32>
    %73 = tpu.matmul %72, %70, %cst_26 {dimension_numbers = #tpu.dot_dimension_numbers<[1], [0], [0], [1], [0, 0, 1, 1], [], []>} : vector<8x4xf32>, vector<4x768xf32>, vector<8x768xf32> -> vector<8x768xf32>
    %74 = arith.addf %66, %73 : vector<8x768xf32>
    %75 = vector.extract_strided_slice %0 {offsets = [0, 144], sizes = [4, 768], strides = [1, 1]} : vector<4x1024xf32> to vector<4x768xf32>
    %c0_i32_27 = arith.constant 0 : i32
    %76 = arith.sitofp %c0_i32_27 : i32 to f32
    %77 = vector.broadcast %76 : f32 to vector<4x768xf32>
    %78 = arith.select %35, %75, %77 : vector<4x768xi1>, vector<4x768xf32>
    %c4 = arith.constant 4 : index
    %c0_28 = arith.constant 0 : index
    %c0_29 = arith.constant 0 : index
    %79 = vector.load %arg2[%c4, %c0_28, %c0_29] : memref<9x8x4xf32, #tpu.memory_space<vmem>>, vector<1x8x4xf32>
    %80 = vector.shape_cast %79 : vector<1x8x4xf32> to vector<8x4xf32>
    %cst_30 = arith.constant dense<0.000000e+00> : vector<8x768xf32>
    %81 = tpu.matmul %80, %78, %cst_30 {dimension_numbers = #tpu.dot_dimension_numbers<[1], [0], [0], [1], [0, 0, 1, 1], [], []>} : vector<8x4xf32>, vector<4x768xf32>, vector<8x768xf32> -> vector<8x768xf32>
    %82 = arith.addf %74, %81 : vector<8x768xf32>
    %83 = vector.extract_strided_slice %0 {offsets = [0, 145], sizes = [4, 768], strides = [1, 1]} : vector<4x1024xf32> to vector<4x768xf32>
    %c0_i32_31 = arith.constant 0 : i32
    %84 = arith.sitofp %c0_i32_31 : i32 to f32
    %85 = vector.broadcast %84 : f32 to vector<4x768xf32>
    %86 = arith.select %41, %83, %85 : vector<4x768xi1>, vector<4x768xf32>
    %c5 = arith.constant 5 : index
    %c0_32 = arith.constant 0 : index
    %c0_33 = arith.constant 0 : index
    %87 = vector.load %arg2[%c5, %c0_32, %c0_33] : memref<9x8x4xf32, #tpu.memory_space<vmem>>, vector<1x8x4xf32>
    %88 = vector.shape_cast %87 : vector<1x8x4xf32> to vector<8x4xf32>
    %cst_34 = arith.constant dense<0.000000e+00> : vector<8x768xf32>
    %89 = tpu.matmul %88, %86, %cst_34 {dimension_numbers = #tpu.dot_dimension_numbers<[1], [0], [0], [1], [0, 0, 1, 1], [], []>} : vector<8x4xf32>, vector<4x768xf32>, vector<8x768xf32> -> vector<8x768xf32>
    %90 = arith.addf %82, %89 : vector<8x768xf32>
    %91 = vector.extract_strided_slice %0 {offsets = [0, 159], sizes = [4, 768], strides = [1, 1]} : vector<4x1024xf32> to vector<4x768xf32>
    %c0_i32_35 = arith.constant 0 : i32
    %92 = arith.sitofp %c0_i32_35 : i32 to f32
    %93 = vector.broadcast %92 : f32 to vector<4x768xf32>
    %94 = arith.select %38, %91, %93 : vector<4x768xi1>, vector<4x768xf32>
    %c6 = arith.constant 6 : index
    %c0_36 = arith.constant 0 : index
    %c0_37 = arith.constant 0 : index
    %95 = vector.load %arg2[%c6, %c0_36, %c0_37] : memref<9x8x4xf32, #tpu.memory_space<vmem>>, vector<1x8x4xf32>
    %96 = vector.shape_cast %95 : vector<1x8x4xf32> to vector<8x4xf32>
    %cst_38 = arith.constant dense<0.000000e+00> : vector<8x768xf32>
    %97 = tpu.matmul %96, %94, %cst_38 {dimension_numbers = #tpu.dot_dimension_numbers<[1], [0], [0], [1], [0, 0, 1, 1], [], []>} : vector<8x4xf32>, vector<4x768xf32>, vector<8x768xf32> -> vector<8x768xf32>
    %98 = arith.addf %90, %97 : vector<8x768xf32>
    %99 = vector.extract_strided_slice %0 {offsets = [0, 160], sizes = [4, 768], strides = [1, 1]} : vector<4x1024xf32> to vector<4x768xf32>
    %c0_i32_39 = arith.constant 0 : i32
    %100 = arith.sitofp %c0_i32_39 : i32 to f32
    %101 = vector.broadcast %100 : f32 to vector<4x768xf32>
    %102 = arith.select %35, %99, %101 : vector<4x768xi1>, vector<4x768xf32>
    %c7 = arith.constant 7 : index
    %c0_40 = arith.constant 0 : index
    %c0_41 = arith.constant 0 : index
    %103 = vector.load %arg2[%c7, %c0_40, %c0_41] : memref<9x8x4xf32, #tpu.memory_space<vmem>>, vector<1x8x4xf32>
    %104 = vector.shape_cast %103 : vector<1x8x4xf32> to vector<8x4xf32>
    %cst_42 = arith.constant dense<0.000000e+00> : vector<8x768xf32>
    %105 = tpu.matmul %104, %102, %cst_42 {dimension_numbers = #tpu.dot_dimension_numbers<[1], [0], [0], [1], [0, 0, 1, 1], [], []>} : vector<8x4xf32>, vector<4x768xf32>, vector<8x768xf32> -> vector<8x768xf32>
    %106 = arith.addf %98, %105 : vector<8x768xf32>
    %107 = vector.extract_strided_slice %0 {offsets = [0, 161], sizes = [4, 768], strides = [1, 1]} : vector<4x1024xf32> to vector<4x768xf32>
    %c0_i32_43 = arith.constant 0 : i32
    %108 = arith.sitofp %c0_i32_43 : i32 to f32
    %109 = vector.broadcast %108 : f32 to vector<4x768xf32>
    %110 = arith.select %41, %107, %109 : vector<4x768xi1>, vector<4x768xf32>
    %c8 = arith.constant 8 : index
    %c0_44 = arith.constant 0 : index
    %c0_45 = arith.constant 0 : index
    %111 = vector.load %arg2[%c8, %c0_44, %c0_45] : memref<9x8x4xf32, #tpu.memory_space<vmem>>, vector<1x8x4xf32>
    %112 = vector.shape_cast %111 : vector<1x8x4xf32> to vector<8x4xf32>
    %cst_46 = arith.constant dense<0.000000e+00> : vector<8x768xf32>
    %113 = tpu.matmul %112, %110, %cst_46 {dimension_numbers = #tpu.dot_dimension_numbers<[1], [0], [0], [1], [0, 0, 1, 1], [], []>} : vector<8x4xf32>, vector<4x768xf32>, vector<8x768xf32> -> vector<8x768xf32>
    %114 = arith.addf %106, %113 : vector<8x768xf32>
    %cst_47 = arith.constant dense<0.000000e+00> : vector<8xf32>
    %115 = vector.multi_reduction <add>, %114, %cst_47 [1] : vector<8x768xf32> to vector<8xf32>
    %116 = vector.shape_cast %115 : vector<8xf32> to vector<8x1xf32>
    %117 = arith.mulf %114, %114 : vector<8x768xf32>
    %cst_48 = arith.constant dense<0.000000e+00> : vector<8xf32>
    %118 = vector.multi_reduction <add>, %117, %cst_48 [1] : vector<8x768xf32> to vector<8xf32>
    %119 = vector.shape_cast %118 : vector<8xf32> to vector<8x1xf32>
    %cst_49 = arith.constant 0.001953125 : f32
    %120 = vector.broadcast %cst_49 : f32 to vector<8x1xf32>
    %121 = arith.mulf %116, %120 : vector<8x1xf32>
    %cst_50 = arith.constant 0.001953125 : f32
    %122 = vector.broadcast %cst_50 : f32 to vector<8x1xf32>
    %123 = arith.mulf %119, %122 : vector<8x1xf32>
    %124 = arith.mulf %121, %121 : vector<8x1xf32>
    %125 = arith.subf %123, %124 : vector<8x1xf32>
    %cst_51 = arith.constant 0.000000e+00 : f32
    %126 = vector.broadcast %cst_51 : f32 to vector<8x1xf32>
    %127 = arith.maximumf %125, %126 : vector<8x1xf32>
    %cst_52 = arith.constant 9.99999974E-6 : f32
    %128 = vector.broadcast %cst_52 : f32 to vector<8x1xf32>
    %129 = arith.addf %127, %128 : vector<8x1xf32>
    %130 = math.rsqrt %129 : vector<8x1xf32>
    %c0_53 = arith.constant 0 : index
    %c0_54 = arith.constant 0 : index
    %131 = vector.load %arg3[%c0_53, %c0_54] : memref<8x2xf32, #tpu.memory_space<vmem>>, vector<8x1xf32>
    %132 = arith.mulf %131, %130 : vector<8x1xf32>
    %c0_55 = arith.constant 0 : index
    %c1_56 = arith.constant 1 : index
    %133 = vector.load %arg3[%c0_55, %c1_56] : memref<8x2xf32, #tpu.memory_space<vmem>>, vector<8x1xf32>
    %134 = arith.mulf %121, %132 : vector<8x1xf32>
    %135 = arith.subf %133, %134 : vector<8x1xf32>
    %136 = vector.broadcast %132 : vector<8x1xf32> to vector<8x768xf32>
    %137 = arith.mulf %114, %136 : vector<8x768xf32>
    %138 = vector.broadcast %135 : vector<8x1xf32> to vector<8x768xf32>
    %139 = arith.addf %137, %138 : vector<8x768xf32>
    %cst_57 = arith.constant 0.000000e+00 : f32
    %140 = vector.broadcast %cst_57 : f32 to vector<8x768xf32>
    %141 = arith.maximumf %139, %140 : vector<8x768xf32>
    %142 = vector.extract_strided_slice %141 {offsets = [0, 0], sizes = [8, 256], strides = [1, 1]} : vector<8x768xf32> to vector<8x256xf32>
    %c0_58 = arith.constant 0 : index
    %c0_59 = arith.constant 0 : index
    %c0_60 = arith.constant 0 : index
    %143 = vector.load %arg4[%c0_58, %c0_59, %c0_60] : memref<2x8x256xf32, #tpu.memory_space<vmem>>, vector<1x8x256xf32>
    %144 = vector.shape_cast %143 : vector<1x8x256xf32> to vector<8x256xf32>
    %145 = vector.shape_cast %142 : vector<8x256xf32> to vector<1x8x256xf32>
    tpu.vector_store %arg4[%c0_58, %c0_59, %c0_60], %145 {strides = array<i32>} : memref<2x8x256xf32, #tpu.memory_space<vmem>>, vector<1x8x256xf32>,
    %146 = vector.extract_strided_slice %141 {offsets = [0, 384], sizes = [8, 256], strides = [1, 1]} : vector<8x768xf32> to vector<8x256xf32>
    %c1_61 = arith.constant 1 : index
    %c0_62 = arith.constant 0 : index
    %c0_63 = arith.constant 0 : index
    %147 = vector.load %arg4[%c1_61, %c0_62, %c0_63] : memref<2x8x256xf32, #tpu.memory_space<vmem>>, vector<1x8x256xf32>
    %148 = vector.shape_cast %147 : vector<1x8x256xf32> to vector<8x256xf32>
    %149 = vector.shape_cast %146 : vector<8x256xf32> to vector<1x8x256xf32>
    tpu.vector_store %arg4[%c1_61, %c0_62, %c0_63], %149 {strides = array<i32>} : memref<2x8x256xf32, #tpu.memory_space<vmem>>, vector<1x8x256xf32>,
    return
  }
  func.func @transform_0(%arg0: i32) -> (i32, i32) {
    %c0_i32 = arith.constant 0 : i32
    %c0_i32_0 = arith.constant 0 : i32
    %c0_i32_1 = arith.constant 0 : i32
    return %c0_i32, %c0_i32_0 : i32, i32
  }
  func.func @transform_1(%arg0: i32) -> (i32, i32, i32) {
    %c0_i32 = arith.constant 0 : i32
    %c0_i32_0 = arith.constant 0 : i32
    %c0_i32_1 = arith.constant 0 : i32
    %c0_i32_2 = arith.constant 0 : i32
    return %c0_i32, %c0_i32_0, %c0_i32_1 : i32, i32, i32
  }
  func.func @transform_2(%arg0: i32) -> (i32, i32) {
    %c0_i32 = arith.constant 0 : i32
    %c0_i32_0 = arith.constant 0 : i32
    %c0_i32_1 = arith.constant 0 : i32
    return %c0_i32, %c0_i32_0 : i32, i32
  }
  func.func @transform_3(%arg0: i32) -> (i32, i32, i32) {
    %c0_i32 = arith.constant 0 : i32
    %c0_i32_0 = arith.constant 0 : i32
    %c0_i32_1 = arith.constant 0 : i32
    %c0_i32_2 = arith.constant 0 : i32
    return %c0_i32, %c0_i32_0, %c0_i32_1 : i32, i32, i32
  }
}

</mosaic_0001>

<bundles_post_ra>
// kernel: tpu_custom_call.1
= control target key start
LH: loop header
LB: loop body
LE: loop exit
PB: predicated region body
PF: predicated region fallthrough
CT: control target
= control target key end

     0   :  { %s3092_s0 = inlined_call_operand.vmem [shape: f32[4,1024], index: 0, kind: input, shape index: {}]   ;;  %s3093_s1 = inlined_call_operand.vmem [shape: f32[9,8,4], index: 1, kind: input, shape index: {}]   ;;  %s3094_s2 = inlined_call_operand.vmem [shape: f32[8,2], index: 2, kind: input, shape index: {}]   ;;  %s3095_s3 = inlined_call_operand.hbm [shape: f32[2,8,256], index: 3, kind: output, shape index: {}]  }
   0x1   :  { %v2352_v0 = vld [vmem:[%s3092_s0 + $0x8] sm:$0xff]  ;;  %v2357_v1 = vld [vmem:[%s3092_s0] sm:$0xff]  ;;  %v2362_v2 = vld [vmem:[%s3092_s0 + $0x10] sm:$0xff] }
   0x2   :  { %338 = vst [vmem:[#allocation1 + $0x10] ss:$2 sm:$0xff] %v2352_v0  ;;  %v2368_v3 = vld [vmem:[%s3092_s0 + $0x18] sm:$0xff] }
   0x3   :  { %336 = vst [vmem:[#allocation1] ss:$2 sm:$0xff] %v2357_v1 }
   0x4   :  { %8 = vsyncpa [#allocation3], 0  ;;  %340 = vst [vmem:[#allocation1 + $0x20] ss:$2 sm:$0xff] %v2362_v2  ;;  %s2316_s20 = smov 1   ;;  %s2317_s0 = smov 127   ;;  %v19_v39 = vlaneseq }
   0x5   :  { %342 = vst [vmem:[#allocation1 + $0x30] ss:$2 sm:$0xff] %v2368_v3  ;;  %s2318_s21 = smov 113   ;;  %s2319_s22 = smov 112   ;;  %vm3104_vm13 = vcmask 1043456   ;;  %vm3096_vm15 = vcmask 31744  }
   0x6   :  { %v2424_v40 = vand.u32 127, %v19_v39  ;;  %s2321_s23 = smov 111   ;;  %s2322_s26 = smov 97  }
   0x7   :  { %s2323_s27 = smov 96   ;;  %s2324_s30 = smov 95  }
   0x8   :  { %v2438_v45 = vadd.s32 256, %v2424_v40  ;;  %v101_v46 = vand.u32 65535, %v2424_v40  ;;  %v2443_v47 = vadd.s32 512, %v2424_v40  ;;  %v102_v49 = vshrl.u32 %v2424_v40, 16 }
   0x9   :  { %v345_v4 = vld.sshfl [vmem:[#allocation1 + $0x10] sm:$0xff pattern:$0x75316420]  ;;  %v346_v5 = vld.sshfl [vmem:[#allocation1 + $0x18] sm:$0xff pattern:$0x75316420] }
   0xa   :  { %354 = vrot.lane.b32.xlu1 %v345_v4, %s2316_s20  ;;  %386 = vst [vmem:[#allocation1 + $0x10] ss:$2 sm:$0xff] %v2352_v0  ;;  %v343_v6 = vld.sshfl [vmem:[#allocation1] sm:$0xff pattern:$0x75316420]  ;;  %v159_v48 = vand.u32 65535, %v2438_v45 }
   0xb   :  { %350 = vrot.lane.b32.xlu0 %v343_v6, %s2316_s20  ;;  %v347_v7 = vld.sshfl [vmem:[#allocation1 + $0x20] sm:$0xff pattern:$0x75316420]  ;;  %v344_v8 = vld.sshfl [vmem:[#allocation1 + $0x8] sm:$0xff pattern:$0x75316420] }
   0xc   :  { %384 = vst [vmem:[#allocation1] ss:$2 sm:$0xff] %v2357_v1  ;;  %v348_v9 = vld.sshfl [vmem:[#allocation1 + $0x28] sm:$0xff pattern:$0x75316420]  ;;  %v160_v50 = vshrl.u32 %v2438_v45, 16 }
   0xd   :  { %360 = vrot.lane.b32.xlu2 %v348_v9, %s2316_s20  ;;  %388 = vst [vmem:[#allocation1 + $0x20] ss:$2 sm:$0xff] %v2362_v2  ;;  %v349_v10 = vld.sshfl [vmem:[#allocation1 + $0x30] sm:$0xff pattern:$0x75316420]  ;;  %v105_v51 = vmul.u32 43690, %v101_v46 }
   0xe   :  { %390 = vst [vmem:[#allocation1 + $0x30] ss:$2 sm:$0xff] %v2368_v3  ;;  %v163_v52 = vmul.u32 43690, %v159_v48  ;;  %v104_v53 = vmul.u32 43691, %v101_v46  ;;  %v2449_v54 = vmul.u32 43691, %v102_v49  ;;  %v217_v55 = vand.u32 65535, %v2443_v47 }
   0xf   :  { %v162_v57 = vmul.u32 43691, %v159_v48  ;;  %v164_v58 = vmul.u32 43691, %v160_v50  ;;  %v108_v59 = vshll.u32 %v105_v51, 16  ;;  %v218_v60 = vshrl.u32 %v2443_v47, 16 }
  0x10   :  { %v166_v61 = vshll.u32 %v163_v52, 16  ;;  %v107_v62 = vmul.u32 43690, %v102_v49  ;;  %v110_v63 = vshll.u32 %v2449_v54, 16  ;;  %v165_v9 = vmul.u32 43690, %v160_v50 }
  0x11   :  { %v2380_v11 = vld.sshfl [vmem:[#allocation1 + $0x10] sm:$0xff pattern:$0x75316420]  ;;  %v2382_v12 = vld.sshfl [vmem:[#allocation1 + $0x18] sm:$0xff pattern:$0x75316420]  ;;  %vm2461_vm0 = vc.u32 %v104_v53, %v108_v59 }
  0x12   :  { %697 = vst [vmem:[#allocation1 + $0x10] ss:$2 sm:$0xff] %v2352_v0  ;;  %358 = vrot.lane.b32.xlu1 %v347_v7, %s2316_s20  ;;  %v114_v7 = vadd.s32 %v108_v59, %v104_v53  ;;  %vm170_vm1 = vc.u32 %v162_v57, %v166_v61  ;;  %v2502_v59 = vadd.s32 384, %v2424_v40 }
  0x13   :  { %352 = vrot.lane.b32.xlu0 %v344_v8, %s2316_s20  ;;  %v2387_v13 = vld.sshfl [vmem:[#allocation1 + $0x8] sm:$0xff pattern:$0x75316420] }
  0x14   :  { %v2389_v14 = vld.sshfl [vmem:[#allocation1 + $0x20] sm:$0xff pattern:$0x75316420]  ;;  %v2391_v15 = vld.sshfl [vmem:[#allocation1 + $0x28] sm:$0xff pattern:$0x75316420]  ;;  %vm116_vm2 = vc.u32 %v114_v7, %v110_v63 }
  0x15   :  { %699 = vst [vmem:[#allocation1 + $0x20] ss:$2 sm:$0xff] %v2362_v2  ;;  %v2394_v16 = vld.sshfl [vmem:[#allocation1 + $0x30] sm:$0xff pattern:$0x75316420]  ;;  %356 = vrot.lane.b32.xlu2 %v346_v5, %s2316_s20  ;;  %v188_v6 = vand.u32 65535, %v2502_v59 }
  0x16   :  { %701 = vst [vmem:[#allocation1 + $0x30] ss:$2 sm:$0xff] %v2368_v3 }
  0x17   :  { %695 = vst [vmem:[#allocation1] ss:$2 sm:$0xff] %v2357_v1 }
  0x19   :  { %v704_v17 = vld.sshfl [vmem:[#allocation1 + $0x18] sm:$0xff pattern:$0x75316420]  ;;  %v703_v18 = vld.sshfl [vmem:[#allocation1 + $0x10] sm:$0xff pattern:$0x75316420] }
  0x1a   :  { %713 = vrot.lane.b32.xlu1 %v704_v17, %s2317_s0  ;;  %893 = vst [vmem:[#allocation1 + $0x10] ss:$2 sm:$0xff] %v2352_v0  ;;  %v2320_v17 = vmov 0  }
  0x1b   :  { %362 = vrot.lane.b32.xlu0 %v349_v10, %s2316_s20  ;;  %v172_v10 = vadd.s32 %v166_v61, %v162_v57  ;;  %2285 = vset.pattern.permute.xlu1 %v2320_v17 }
  0x1c   :  { %v705_v19 = vld.sshfl [vmem:[#allocation1 + $0x20] sm:$0xff pattern:$0x75316420]  ;;  %v706_v20 = vld.sshfl [vmem:[#allocation1 + $0x28] sm:$0xff pattern:$0x75316420] }
  0x1d   :  { %715 = vrot.lane.b32.xlu2 %v705_v19, %s2317_s0  ;;  %895 = vst [vmem:[#allocation1 + $0x20] ss:$2 sm:$0xff] %v2362_v2  ;;  %v708_v21 = vld.sshfl [vmem:[#allocation1 + $0x38] sm:$0xff pattern:$0x75316420]  ;;  %v168_v19 = vshll.u32 %v164_v58, 16 }
  0x1e   :  { %v702_v22 = vld.sshfl [vmem:[#allocation1 + $0x8] sm:$0xff pattern:$0x75316420]  ;;  %v707_v23 = vld.sshfl [vmem:[#allocation1 + $0x30] sm:$0xff pattern:$0x75316420] }
  0x1f   :  { %891 = vst [vmem:[#allocation1] ss:$2 sm:$0xff] %v2357_v1  ;;  %vm174_vm3 = vc.u32 %v172_v10, %v168_v19  ;;  %v191_v19 = vmul.u32 43691, %v188_v6 }
  0x20   :  { %897 = vst [vmem:[#allocation1 + $0x30] ss:$2 sm:$0xff] %v2368_v3 }
  0x21   :  { %v899_v24 = vld.sshfl [vmem:[#allocation1 + $0x10] sm:$0xff pattern:$0x75316420]  ;;  %v900_v25 = vld.sshfl [vmem:[#allocation1 + $0x18] sm:$0xff pattern:$0x75316420] }
  0x22   :  { %711 = vrot.lane.b32.xlu1 %v703_v18, %s2317_s0  ;;  %1089 = vst [vmem:[#allocation1 + $0x10] ss:$2 sm:$0xff] %v2352_v0 }
  0x23   :  { %709 = vrot.lane.b32.xlu0 %v702_v22, %s2317_s0  ;;  %v113_v22 = vsel %vm2461_vm0, 1, %v2320_v17 }
  0x24   :  { %v901_v26 = vld.sshfl [vmem:[#allocation1 + $0x20] sm:$0xff pattern:$0x75316420]  ;;  %v902_v27 = vld.sshfl [vmem:[#allocation1 + $0x28] sm:$0xff pattern:$0x75316420] }
  0x25   :  { %717 = vrot.lane.b32.xlu2 %v706_v20, %s2317_s0  ;;  %1091 = vst [vmem:[#allocation1 + $0x20] ss:$2 sm:$0xff] %v2362_v2  ;;  %v171_v20 = vsel %vm170_vm1, 1, %v2320_v17 }
  0x26   :  { %v898_v28 = vld.sshfl [vmem:[#allocation1 + $0x8] sm:$0xff pattern:$0x75316420] }
  0x27   :  { %1087 = vst [vmem:[#allocation1] ss:$2 sm:$0xff] %v2357_v1  ;;  %v903_v29 = vld.sshfl [vmem:[#allocation1 + $0x30] sm:$0xff pattern:$0x75316420] }
  0x28   :  { %v904_v30 = vld.sshfl [vmem:[#allocation1 + $0x38] sm:$0xff pattern:$0x75316420] }
  0x29   :  { %1093 = vst [vmem:[#allocation1 + $0x30] ss:$2 sm:$0xff] %v2368_v3  ;;  %v1096_v31 = vld.sshfl [vmem:[#allocation1 + $0x18] sm:$0xff pattern:$0x75316420] }
  0x2a   :  { %907 = vrot.lane.b32.xlu1 %v899_v24, %s2318_s21  ;;  %v1095_v32 = vld.sshfl [vmem:[#allocation1 + $0x10] sm:$0xff pattern:$0x75316420]  ;;  %v167_v24 = vshrl.u32 %v163_v52, 16 }
  0x2b   :  { %905 = vrot.lane.b32.xlu0 %v898_v28, %s2318_s21  ;;  %1285 = vst [vmem:[#allocation1 + $0x10] ss:$2 sm:$0xff] %v2352_v0  ;;  %v220_v28 = vmul.u32 43691, %v217_v55 }
  0x2c   :  { %v1097_v33 = vld.sshfl [vmem:[#allocation1 + $0x20] sm:$0xff pattern:$0x75316420]  ;;  %v1098_v34 = vld.sshfl [vmem:[#allocation1 + $0x28] sm:$0xff pattern:$0x75316420] }
  0x2d   :  { %719 = vrot.lane.b32.xlu2 %v707_v23, %s2317_s0  ;;  %1287 = vst [vmem:[#allocation1 + $0x20] ss:$2 sm:$0xff] %v2362_v2  ;;  %v117_v23 = vsel %vm116_vm2, 1, %v2320_v17 }
  0x2e   :  { %v1094_v35 = vld.sshfl [vmem:[#allocation1 + $0x8] sm:$0xff pattern:$0x75316420] }
  0x2f   :  { %1283 = vst [vmem:[#allocation1] ss:$2 sm:$0xff] %v2357_v1 }
  0x30   :  { %v2418_v36 = vld.sshfl [vmem:[#allocation1 + $0x30] sm:$0xff pattern:$0x75316420]  ;;  %v2420_v37 = vld.sshfl [vmem:[#allocation1 + $0x38] sm:$0xff pattern:$0x75316420] }
  0x31   :  { %1289 = vst [vmem:[#allocation1 + $0x30] ss:$2 sm:$0xff] %v2368_v3 }
  0x32   :  { %721 = vrot.lane.b32.xlu1 %v708_v21, %s2317_s0  ;;  %v2426_v41 = vld.sshfl [vmem:[#allocation1 + $0x10] sm:$0xff pattern:$0x75316420]  ;;  %v2435_v44 = vld.sshfl [vmem:[#allocation1 + $0x18] sm:$0xff pattern:$0x75316420] }
  0x33   :  { %909 = vrot.lane.b32.xlu0 %v900_v25, %s2318_s21  ;;  %1481 = vst [vmem:[#allocation1 + $0x10] ss:$2 sm:$0xff] %v2352_v0  ;;  %v109_v21 = vshrl.u32 %v105_v51, 16  ;;  %v173_v25 = vadd.s32 %v171_v20, %v165_v9  ;;  %v2508_v20 = vmul.u32 43690, %v188_v6 }
  0x34   :  { %v2429_v42 = vld.sshfl [vmem:[#allocation1 + $0x28] sm:$0xff pattern:$0x75316420]  ;;  %v2431_v43 = vld.sshfl [vmem:[#allocation1 + $0x20] sm:$0xff pattern:$0x75316420] }
  0x35   :  { %913 = vrot.lane.b32.xlu2 %v902_v27, %s2318_s21  ;;  %1483 = vst [vmem:[#allocation1 + $0x20] ss:$2 sm:$0xff] %v2362_v2  ;;  %v175_v27 = vsel %vm174_vm3, 1, %v2320_v17 }
  0x36   :  { %v1290_v38 = vld.sshfl [vmem:[#allocation1 + $0x8] sm:$0xff pattern:$0x75316420] }
  0x37   :  { %1479 = vst [vmem:[#allocation1] ss:$2 sm:$0xff] %v2357_v1 }
  0x38   :  { %v2452_v56 = vld.sshfl [vmem:[#allocation1 + $0x38] sm:$0xff pattern:$0x75316420]  ;;  %v2459_v5 = vld.sshfl [vmem:[#allocation1 + $0x30] sm:$0xff pattern:$0x75316420] }
  0x39   :  { %1485 = vst [vmem:[#allocation1 + $0x30] ss:$2 sm:$0xff] %v2368_v3 }
  0x3a   :  { %911 = vrot.lane.b32.xlu1 %v901_v26, %s2318_s21  ;;  %v115_v26 = vadd.s32 %v113_v22, %v107_v62  ;;  %v2484_v46 = vld.sshfl [vmem:[#allocation1 + $0x18] sm:$0xff pattern:$0x75316420]  ;;  %v2486_v48 = vld.sshfl [vmem:[#allocation1 + $0x10] sm:$0xff pattern:$0x75316420] }
  0x3b   :  { %915 = vrot.lane.b32.xlu0 %v903_v29, %s2318_s21  ;;  %v221_v29 = vmul.u32 43690, %v217_v55  ;;  %1677 = vst [vmem:[#allocation1 + $0x10] ss:$2 sm:$0xff] %v2352_v0 }
  0x3c   :  { %v2457_v4 = vld.sshfl [vmem:[#allocation1 + $0x20] sm:$0xff pattern:$0x75316420]  ;;  %v2471_v18 = vld.sshfl [vmem:[#allocation1 + $0x28] sm:$0xff pattern:$0x75316420] }
  0x3d   :  { %917 = vrot.lane.b32.xlu2 %v904_v30, %s2318_s21  ;;  %1679 = vst [vmem:[#allocation1 + $0x20] ss:$2 sm:$0xff] %v2362_v2  ;;  %v222_v30 = vmul.u32 43691, %v218_v60  ;;  %s2144_s21 = sshll.u32 %s3095_s3, 4  ;;  %s2145_s21 = int_to_ptr.hbm [resolvable:$true] %s2144_s21 }
  0x3e   :  { %v2467_v8 = vld.sshfl [vmem:[#allocation1 + $0x8] sm:$0xff pattern:$0x75316420] }
  0x3f   :  { %1675 = vst [vmem:[#allocation1] ss:$2 sm:$0xff] %v2357_v1  ;;  %v226_v39 = vshll.u32 %v222_v30, 16  ;;  %v227_v62 = vshrl.u32 %v222_v30, 16 }
  0x40   :  { %v2492_v52 = vld.sshfl [vmem:[#allocation1 + $0x30] sm:$0xff pattern:$0x75316420] }
  0x42   :  { %1107 = vrot.lane.b32.xlu1 %v1097_v33, %s2319_s22  ;;  %v111_v33 = vshrl.u32 %v2449_v54, 16  ;;  %v2495_v54 = vld.sshfl [vmem:[#allocation1 + $0x38] sm:$0xff pattern:$0x75316420] }
  0x43   :  { %1105 = vrot.lane.b32.xlu0 %v1096_v31, %s2319_s22  ;;  %v169_v31 = vshrl.u32 %v164_v58, 16  ;;  %1681 = vst [vmem:[#allocation1 + $0x30] ss:$2 sm:$0xff] %v2368_v3 }
  0x45   :  { %1101 = vrot.lane.b32.xlu2 %v1094_v35, %s2319_s22  ;;  %v223_v35 = vmul.u32 43690, %v218_v60 }
  0x46   :  { %v2490_v51 = vld.sshfl [vmem:[#allocation1 + $0x8] sm:$0xff pattern:$0x75316420] }
  0x47   :  { %1871 = vst [vmem:[#allocation1] ss:$2 sm:$0xff] %v2357_v1 }
  0x4a   :  { %1109 = vrot.lane.b32.xlu1 %v1098_v34, %s2319_s22  ;;  %v119_v34 = vadd.s32 %v117_v23, %v115_v26  ;;  %v2515_v23 = vadd.s32 128, %v2424_v40  ;;  %v195_v26 = vshll.u32 %v2508_v20, 16 }
  0x4b   :  { %1103 = vrot.lane.b32.xlu0 %v1095_v32, %s2319_s22  ;;  %v177_v32 = vadd.s32 %v175_v27, %v173_v25 }
  0x4c   :  { %v120_v50 = vadd.s32 %v119_v34, %v109_v21  ;;  %vm199_vm10 = vc.u32 %v191_v19, %v195_v26 }
  0x4d   :  { %1297 = vrot.lane.b32.xlu2 %v1290_v38, %s2321_s23  ;;  %v224_v38 = vshll.u32 %v221_v29, 16  ;;  %v178_v49 = vadd.s32 %v177_v32, %v167_v24 }
  0x4e   :  { %v121_v55 = vadd.s32 %v120_v50, %v111_v33  ;;  %v131_v33 = vshrl.u32 %v2515_v23, 16  ;;  %v201_v50 = vadd.s32 %v195_v26, %v191_v19  ;;  %v3132_v19 = vmov 0 }
  0x4f   :  { %vm228_vm4 = vc.u32 %v220_v28, %v224_v38  ;;  %v230_v53 = vadd.s32 %v224_v38, %v220_v28  ;;  %v200_v38 = vsel %vm199_vm10, 1, %v2320_v17 }
  0x50   :  { %v229_v57 = vsel %vm228_vm4, 1, %v2320_v17  ;;  %v122_v60 = vshrl.u32 %v121_v55, 8 }
  0x51   :  { %v231_v58 = vadd.s32 %v229_v57, %v223_v35  ;;  %vm232_vm5 = vc.u32 %v230_v53, %v226_v39  ;;  %v2538_v35 = vld [vmem:[%s3093_s1 + $0x8] sm:$0xff]  ;;  %v2541_v39 = vld.sshfl [vmem:[#allocation1 + $0x18] sm:$0xff pattern:$0x75316420] }
  0x52   :  { %1111 = vrot.lane.b32.xlu1 %v2418_v36, %s2319_s22  ;;  %v179_v36 = vadd.s32 %v178_v49, %v169_v31  ;;  %v233_v61 = vsel %vm232_vm5, 1, %v2320_v17  ;;  %v123_v9 = vmul.u32 384, %v122_v60 }
  0x53   :  { %1299 = vrot.lane.b32.xlu0 %v2426_v41, %s2321_s23  ;;  %v225_v41 = vshrl.u32 %v221_v29, 16  ;;  %v235_v63 = vadd.s32 %v233_v61, %v231_v58 }
  0x54   :  { %v180_v1 = vshrl.u32 %v179_v36, 8  ;;  %v124_v22 = vsub.s32 %v2424_v40, %v123_v9  ;;  %v2547_v36 = vadd.s32 640, %v2424_v40 }
  0x55   :  { %1301 = vrot.lane.b32.xlu2 %v2435_v44, %s2321_s23  ;;  %v189_v44 = vshrl.u32 %v2502_v59, 16  ;;  %v236_v10 = vadd.s32 %v235_v63, %v225_v41  ;;  %v2555_v41 = vld.sshfl [vmem:[#allocation1 + $0x10] sm:$0xff pattern:$0x75316420] }
  0x56   :  { %v181_v7 = vmul.u32 384, %v180_v1  ;;  %vm272_vm8 = vcmp.ne.s32.totalorder %v124_v22, 0  ;;  %vm278_vm9 = vcmp.lt.s32.totalorder %v124_v22, 0  ;;  %1873 = vst [vmem:[#allocation1 + $0x10] ss:$2 sm:$0xff] %v2352_v0  ;;  %v135_v1 = vmul.u32 43691, %v131_v33 }
  0x57   :  { %v237_v24 = vadd.s32 %v236_v10, %v227_v62  ;;  %v2519_v25 = vmul.u32 43691, %v189_v44  ;;  %v194_v27 = vmul.u32 43690, %v189_v44  ;;  %vm284_vm11 = vmand %vm278_vm9, %vm272_vm8  ;;  %v246_v63 = vand.u32 65535, %v2547_v36 }
  0x58   :  { %v182_v21 = vsub.s32 %v2438_v45, %v181_v7  ;;  %v136_v44 = vmul.u32 43690, %v131_v33  ;;  %v139_v9 = vshll.u32 %v135_v1, 16 }
  0x59   :  { %v238_v29 = vshrl.u32 %v237_v24, 8  ;;  %v197_v32 = vshll.u32 %v2519_v25, 16  ;;  %v202_v53 = vadd.s32 %v200_v38, %v194_v27  ;;  %v198_v0 = vshrl.u32 %v2519_v25, 16 }
  0x5a   :  { %1305 = vrot.lane.b32.xlu1 %v2429_v42, %s2321_s23  ;;  %vm274_vm6 = vcmp.ne.s32.totalorder %v182_v21, 0  ;;  %vm280_vm7 = vcmp.lt.s32.totalorder %v182_v21, 0  ;;  %v290_v42 = vadd.s32 384, %v124_v22  ;;  %v292_v28 = vadd.s32 384, %v182_v21 }
  0x5b   :  { %1113 = vrot.lane.b32.xlu0 %v2420_v37, %s2319_s22  ;;  %v130_v37 = vand.u32 65535, %v2515_v23  ;;  %vm2525_vm12 = vmand %vm280_vm7, %vm274_vm6  ;;  %v239_v34 = vmul.u32 384, %v238_v29  ;;  %vm203_vm0 = vc.u32 %v201_v50, %v197_v32  ;;  %v247_v25 = vshrl.u32 %v2547_v36, 16  ;;  %s2327_s22 = smov 256  }
  0x5c   :  { %v296_v31 = vsel %vm284_vm11, %v290_v42, %v124_v22  ;;  %v298_v55 = vsel %vm2525_vm12, %v292_v28, %v182_v21  ;;  %v204_v61 = vsel %vm203_vm0, 1, %v2320_v17  ;;  %v2584_v22 = vld.sshfl [vmem:[#allocation1 + $0x30] sm:$0xff pattern:$0x75316420]  ;;  %v249_v27 = vmul.u32 43691, %v246_v63 }
  0x5d   :  { %1307 = vrot.lane.b32.xlu2 %v2459_v5, %s2321_s23  ;;  %vm2531_vm14 = vcmp.lt.s32.totalorder %v296_v31, 256  ;;  %v240_v57 = vsub.s32 %v2443_v47, %v239_v34  ;;  %v134_v58 = vmul.u32 43690, %v130_v37  ;;  %vm2566_vm3 = vcmp.lt.s32.totalorder %v298_v55, 256 }
  0x5e   :  { %v403_v49 = vsel %vm2531_vm14, %v2387_v13, 0.0  ;;  %v196_v13 = vshrl.u32 %v2508_v20, 16  ;;  %v206_v62 = vadd.s32 %v204_v61, %v202_v53  ;;  %v405_v20 = vsel %vm2566_vm3, %v2382_v12, 0.0  ;;  %v2592_v12 = vld.sshfl [vmem:[#allocation1 + $0x38] sm:$0xff pattern:$0x75316420] }
  0x5f   :  { %2157 = vmatpush.msk.msra.mxu0 %vm3104_vm13, %v403_v49  ;;  %vm276_vm1 = vcmp.ne.s32.totalorder %v240_v57, 0  ;;  %vm282_vm2 = vcmp.lt.s32.totalorder %v240_v57, 0  ;;  %v294_v60 = vadd.s32 384, %v240_v57  ;;  %v137_v7 = vshll.u32 %v134_v58, 16  ;;  %2161 = vmatpush.msk.msra.mxu2 %vm3104_vm13, %v405_v20  ;;  %1877 = vst [vmem:[#allocation1 + $0x30] ss:$2 sm:$0xff] %v2368_v3 }
  0x60   :  { %2158 = vmatmul.msk.f32.vlgmr.msra.gmra.mxu0 %vm3096_vm15, %v2538_v35  ;;  %vm288_vm4 = vmand %vm282_vm2, %vm276_vm1  ;;  %v250_v28 = vmul.u32 43690, %v246_v63  ;;  %2162 = vmatmul.msk.f32.vlgmr.msra.gmra.mxu2 %vm3096_vm15, %v2538_v35  ;;  %v252_v32 = vmul.u32 43690, %v247_v25  ;;  %v140_v34 = vshrl.u32 %v135_v1, 16 }
  0x61   :  { %v300_v6 = vsel %vm288_vm4, %v294_v60, %v240_v57 }
  0x62   :  { %1309 = vrot.lane.b32.xlu1 %v2452_v56, %s2321_s23  ;;  %v133_v56 = vmul.u32 43691, %v130_v37  ;;  %vm2574_vm5 = vcmp.lt.s32.totalorder %v300_v6, 256  ;;  %v251_v37 = vmul.u32 43691, %v247_v25  ;;  %v253_v33 = vshll.u32 %v250_v28, 16 }
  0x63   :  { %1303 = vrot.lane.b32.xlu0 %v2431_v43, %s2321_s23  ;;  %v3133_v19 = vsel %vm2574_vm5, 4294967295, %v3132_v19  ;;  %v407_v21 = vsel %vm2574_vm5, %v2391_v15, 0.0  ;;  %v138_v15 = vshrl.u32 %v134_v58, 16  ;;  %v254_v57 = vshrl.u32 %v250_v28, 16  ;;  %s2328_s23 = smov 16  }
  0x64   :  { %vm141_vm6 = vc.u32 %v133_v56, %v137_v7  ;;  %v143_v24 = vadd.s32 %v137_v7, %v133_v56  ;;  %2165 = vmatpush.msk.msrb.mxu0 %vm3104_vm13, %v407_v21  ;;  %vm257_vm8 = vc.u32 %v249_v27, %v253_v33  ;;  %v259_v3 = vadd.s32 %v253_v33, %v249_v27 }
  0x65   :  { %1497 = vrot.lane.b32.xlu2 %v2484_v46, %s2322_s26  ;;  %v207_v46 = vadd.s32 %v206_v62, %v196_v13  ;;  %v142_v42 = vsel %vm141_vm6, 1, %v2320_v17  ;;  %v2608_v13 = vld.sshfl [vmem:[#allocation1 + $0x28] sm:$0xff pattern:$0x75316420]  ;;  %v256_v1 = vshrl.u32 %v251_v37, 16  ;;  %v51_v27 = vand.u32 15, %v2502_v59 }
  0x66   :  { %v144_v29 = vadd.s32 %v142_v42, %v136_v44  ;;  %vm145_vm7 = vc.u32 %v143_v24, %v139_v9  ;;  %v3136_v24 = vmov 0  ;;  %v37_v28 = vand.u32 15, %v2515_v23 }
  0x67   :  { %v2572_v10 = vpop.permute.xlu2 %360  ;;  %v208_v26 = vadd.s32 %v207_v46, %v198_v0  ;;  %v146_v31 = vsel %vm145_vm7, 1, %v2320_v17  ;;  %v2611_v0 = vld.sshfl [vmem:[#allocation1 + $0x20] sm:$0xff pattern:$0x75316420]  ;;  %vm3097_vm7 = vcmask 7168  }
  0x68   :  { %2166 = vmatmul.msk.f32.vlgmr.msrb.gmra.mxu0 %vm3096_vm15, %v2538_v35  ;;  %v148_v38 = vadd.s32 %v146_v31, %v144_v29  ;;  %1875 = vst [vmem:[#allocation1 + $0x20] ss:$2 sm:$0xff] %v2362_v2  ;;  %v3140_v31 = vmov 0 }
  0x69   :  { %v209_v30 = vshrl.u32 %v208_v26, 8 }
  0x6a   :  { %1493 = vrot.lane.b32.xlu1 %v2467_v8, %s2322_s26  ;;  %v255_v8 = vshll.u32 %v251_v37, 16  ;;  %v149_v50 = vadd.s32 %v148_v38, %v138_v15 }
  0x6b   :  { %1499 = vrot.lane.b32.xlu0 %v2457_v4, %s2322_s26  ;;  %v210_v49 = vmul.u32 384, %v209_v30  ;;  %v258_v4 = vsel %vm257_vm8, 1, %v2320_v17 }
  0x6c   :  { %v260_v58 = vadd.s32 %v258_v4, %v252_v32  ;;  %vm261_vm9 = vc.u32 %v259_v3, %v255_v8  ;;  %v150_v56 = vadd.s32 %v149_v50, %v140_v34  ;;  %v3142_v32 = vmov 0 }
  0x6d   :  { %1495 = vrot.lane.b32.xlu2 %v2486_v48, %s2322_s26  ;;  %v211_v55 = vsub.s32 %v2502_v59, %v210_v49  ;;  %v262_v60 = vsel %vm261_vm9, 1, %v2320_v17  ;;  %v44_v17 = vand.u32 15, %v2438_v45  ;;  %v3144_v34 = vmov 0 }
  0x6e   :  { %v264_v61 = vadd.s32 %v262_v60, %v260_v58  ;;  %v151_v62 = vshrl.u32 %v150_v56, 8  ;;  %v65_v50 = vand.u32 15, %v2547_v36  ;;  %v1880_v56 = vld.sshfl [vmem:[#allocation1 + $0x18] sm:$0xff pattern:$0x75316420]  ;;  %v3152_v45 = vmov 0 }
  0x6f   :  { %v2605_v53 = vpop.permute.xlu2 %356  ;;  %vm275_vm10 = vcmp.ne.s32.totalorder %v211_v55, 0  ;;  %vm281_vm11 = vcmp.lt.s32.totalorder %v211_v55, 0  ;;  %v293_v48 = vadd.s32 384, %v211_v55  ;;  %vm310_vm1 = vcmp.ge.s32.totalorder %v44_v17, 1 }
  0x70   :  { %vm287_vm12 = vmand %vm281_vm11, %vm275_vm10  ;;  %v265_v6 = vadd.s32 %v264_v61, %v254_v57  ;;  %v152_v7 = vmul.u32 384, %v151_v62  ;;  %v3155_v60 = vmov 0 }
  0x71   :  { %v299_v63 = vsel %vm287_vm12, %v293_v48, %v211_v55  ;;  %vm2643_vm8 = vmand %vm2566_vm3, %vm310_vm1 }
  0x72   :  { %1689 = vrot.lane.b32.xlu1 %v2490_v51, %s2323_s27  ;;  %vm2619_vm0 = vcmp.lt.s32.totalorder %v299_v63, 256  ;;  %v266_v2 = vadd.s32 %v265_v6, %v256_v1  ;;  %v153_v9 = vsub.s32 %v2515_v23, %v152_v7  ;;  %v3137_v24 = vsel %vm2643_vm8, 4294967295, %v3136_v24 }
  0x73   :  { %1501 = vrot.lane.b32.xlu0 %v2471_v18, %s2322_s26  ;;  %v406_v51 = vsel %vm2619_vm0, %v2389_v14, 0.0  ;;  %v58_v14 = vand.u32 15, %v2443_v47  ;;  %v3164_v47 = vmov 0 }
  0x74   :  { %2163 = vmatpush.msk.msra.mxu3 %vm3104_vm13, %v406_v51  ;;  %v267_v46 = vshrl.u32 %v266_v2, 8  ;;  %vm273_vm2 = vcmp.ne.s32.totalorder %v153_v9, 0  ;;  %vm279_vm4 = vcmp.lt.s32.totalorder %v153_v9, 0  ;;  %v1879_v51 = vld.sshfl [vmem:[#allocation1 + $0x10] sm:$0xff pattern:$0x75316420] }
  0x75   :  { %1691 = vrot.lane.b32.xlu2 %v2555_v41, %s2323_s27  ;;  %2164 = vmatmul.msk.f32.vlgmr.msra.gmra.mxu3 %vm3096_vm15, %v2538_v35  ;;  %v291_v41 = vadd.s32 384, %v153_v9  ;;  %vm285_vm6 = vmand %vm279_vm4, %vm273_vm2  ;;  %vm312_vm12 = vcmp.ge.s32.totalorder %v58_v14, 1  ;;  %vm311_vm4 = vcmp.ge.s32.totalorder %v51_v27, 1 }
  0x76   :  { %v268_v20 = vmul.u32 384, %v267_v46  ;;  %v3171_v46 = vmov 0 }
  0x77   :  { %v2630_v18 = vpop.permute.xlu2 %715  ;;  %v297_v21 = vsel %vm285_vm6, %v291_v41, %v153_v9  ;;  %v1878_v9 = vld.sshfl [vmem:[#allocation1 + $0x8] sm:$0xff pattern:$0x75316420] }
  0x78   :  { %vm2647_vm9 = vcmp.lt.s32.totalorder %v297_v21, 256  ;;  %v269_v26 = vsub.s32 %v2547_v36, %v268_v20 }
  0x7a   :  { %1693 = vrot.lane.b32.xlu1 %v2541_v39, %s2323_s27  ;;  %v30_v39 = vand.u32 15, %v2424_v40  ;;  %vm277_vm10 = vcmp.ne.s32.totalorder %v269_v26, 0  ;;  %vm283_vm11 = vcmp.lt.s32.totalorder %v269_v26, 0  ;;  %v295_v37 = vadd.s32 384, %v269_v26 }
  0x7b   :  { %1503 = vrot.lane.b32.xlu0 %v2492_v52, %s2322_s26  ;;  %v404_v52 = vsel %vm2647_vm9, %v2380_v11, 0.0  ;;  %vm289_vm1 = vmand %vm283_vm11, %vm277_vm10  ;;  %vm309_vm11 = vcmp.ge.s32.totalorder %v37_v28, 1  ;;  %v3168_v40 = vmov 0 }
  0x7c   :  { %v355_v42 = vpop.permute.xlu1 %354  ;;  %2159 = vmatpush.msk.msra.mxu1 %vm3104_vm13, %v404_v52  ;;  %v301_v11 = vsel %vm289_vm1, %v295_v37, %v269_v26  ;;  %vm308_vm2 = vcmp.ge.s32.totalorder %v30_v39, 1  ;;  %vm2687_vm10 = vmand %vm2574_vm5, %vm312_vm12 }
  0x7d   :  { %v367_v15 = vsel %vm3097_vm7, %v355_v42, %v2605_v53  ;;  %v351_v29 = vpop.permute.xlu0 %350  ;;  %1505 = vrot.lane.b32.xlu2 %v2495_v54, %s2322_s26  ;;  %2160 = vmatmul.msk.f32.vlgmr.msra.gmra.mxu1 %vm3096_vm15, %v2538_v35  ;;  %v2677_v54 = vld [vmem:[%s3093_s1] sm:$0xff]  ;;  %vm2679_vm6 = vcmp.lt.s32.totalorder %v301_v11, 256  ;;  %v3143_v32 = vsel %vm2687_vm10, 4294967295, %v3142_v32  ;;  %vm2701_vm1 = vmand %vm2531_vm14, %vm308_vm2  ;;  %vm3150_vm2 = vcmask 31744   ;;  %v2194_v11 = vld [vmem:[%s3093_s1 + $0x18] sm:$0xff] }
  0x7e   :  { %v379_v59 = vsel %vm2643_vm8, %v367_v15, 0.0  ;;  %v3141_v31 = vsel %vm2679_vm6, 4294967295, %v3140_v31  ;;  %v408_v33 = vsel %vm2679_vm6, %v2394_v16, 0.0  ;;  %v3145_v34 = vsel %vm2701_vm1, 4294967295, %v3144_v34  ;;  %vm2709_vm12 = vmand %vm2619_vm0, %vm311_vm4 }
  0x7f   :  { %2173 = vmatpush.msk.msra.mxu0 %vm3104_vm13, %v379_v59  ;;  %v2672_v30 = vpop.permute.xlu2 %717  ;;  %2167 = vmatpush.msk.msrb.mxu1 %vm3104_vm13, %v408_v33  ;;  %v3146_v16 = vmov 0  ;;  %vm322_vm4 = vcmp.lt.s32.totalorder %v44_v17, 15 }
  0x80   :  { %2174 = vmatmul.msk.f32.vlgmr.msra.gmra.mxu0 %vm3096_vm15, %v2677_v54  ;;  %v3147_v16 = vsel %vm2709_vm12, 4294967295, %v3146_v16  ;;  %vm2715_vm15 = vmand %vm2647_vm9, %vm309_vm11  ;;  %vm323_vm11 = vcmp.lt.s32.totalorder %v51_v27, 15  ;;  %v2181_v27 = vld [vmem:[%s3093_s1 + $0x10] sm:$0xff] }
  0x82   :  { %1699 = vrot.lane.b32.xlu1 %v2584_v22, %s2323_s27  ;;  %v3148_v22 = vmov 0 }
  0x83   :  { %1697 = vrot.lane.b32.xlu0 %v2608_v13, %s2323_s27  ;;  %v3149_v22 = vsel %vm2715_vm15, 4294967295, %v3148_v22 }
  0x84   :  { %v359_v38 = vpop.permute.xlu1 %358 }
  0x85   :  { %v368_v8 = vsel %vm3097_vm7, %v2605_v53, %v359_v38  ;;  %v369_v49 = vsel %vm3097_vm7, %v359_v38, %v2572_v10  ;;  %v353_v3 = vpop.permute.xlu0 %352  ;;  %1695 = vrot.lane.b32.xlu2 %v2611_v0, %s2323_s27  ;;  %2168 = vmatmul.msk.f32.vlgmr.msrb.gmra.mxu1 %vm3150_vm2, %v2538_v35  ;;  %vm3105_vm2 = vcmask 1039360   ;;  %v1881_v35 = vld.sshfl [vmem:[#allocation1 + $0x20] sm:$0xff pattern:$0x75316420] }
  0x86   :  { %v380_v4 = vsel %vm2709_vm12, %v368_v8, 0.0  ;;  %v381_v55 = vsel %vm2687_vm10, %v369_v49, 0.0  ;;  %v365_v57 = vsel %vm3097_vm7, %v351_v29, %v353_v3  ;;  %v366_v58 = vsel %vm3097_vm7, %v353_v3, %v355_v42  ;;  %vm2753_vm12 = vmand %vm2566_vm3, %vm322_vm4  ;;  %v1884_v42 = vld.sshfl [vmem:[#allocation1 + $0x38] sm:$0xff pattern:$0x75316420] }
  0x87   :  { %v377_v53 = vsel %vm2701_vm1, %v365_v57, 0.0  ;;  %v378_v13 = vsel %vm2715_vm15, %v366_v58, 0.0  ;;  %2175 = vmatpush.msk.msra.mxu1 %vm3104_vm13, %v380_v4  ;;  %v2741_v1 = vpop.permute.xlu2 %719  ;;  %vm313_vm7 = vcmp.ge.s32.totalorder %v65_v50, 1  ;;  %vm3151_vm10 = vcmask 31744  }
  0x88   :  { %2169 = vmatpush.msk.msrb.mxu2 %vm3104_vm13, %v377_v53  ;;  %2171 = vmatpush.msk.msrb.mxu3 %vm3104_vm13, %v378_v13  ;;  %v3153_v45 = vsel %vm2753_vm12, 4294967295, %v3152_v45  ;;  %vm3154_vm8 = vmmov %vm3151_vm10  ;;  %v727_v48 = vsel %vm3105_vm2, %v2630_v18, %v2672_v30  ;;  %vm3161_vm4 = vcmask 1043456  }
  0x89   :  { %2172 = vmatmul.msk.f32.vlgmr.msrb.gmra.mxu3 %vm3151_vm10, %v2677_v54  ;;  %2170 = vmatmul.msk.f32.vlgmr.msrb.gmra.mxu2 %vm3154_vm8, %v2677_v54  ;;  %vm2772_vm10 = vmand %vm2679_vm6, %vm313_vm7  ;;  %vm3159_vm8 = vcmask 7168   ;;  %vm3160_vm7 = vcmask 31744  }
  0x8a   :  { %2177 = vmatpush.msk.msra.mxu2 %vm3104_vm13, %v381_v55  ;;  %1889 = vrot.lane.b32.xlu1 %v1880_v56, %s2324_s30  ;;  %vm2763_vm13 = vmand %vm2619_vm0, %vm323_vm11  ;;  %vm324_vm11 = vcmp.lt.s32.totalorder %v58_v14, 15 }
  0x8b   :  { %1701 = vrot.lane.b32.xlu0 %v2592_v12, %s2323_s27  ;;  %v3156_v60 = vsel %vm2763_vm13, 4294967295, %v3155_v60  ;;  %v739_v63 = vsel %vm2763_vm13, %v727_v48, 0.0 }
  0x8c   :  { %v714_v61 = vpop.permute.xlu1 %713 }
  0x8d   :  { %v726_v12 = vsel %vm3105_vm2, %v714_v61, %v2630_v18  ;;  %v363_v62 = vpop.permute.xlu0 %362  ;;  %1891 = vrot.lane.b32.xlu2 %v1881_v35, %s2324_s30  ;;  %2176 = vmatmul.msk.f32.vlgmr.msra.gmra.mxu1 %vm3160_vm7, %v2677_v54  ;;  %vm3162_vm2 = vmmov %vm3161_vm4  ;;  %vm320_vm7 = vcmp.lt.s32.totalorder %v30_v39, 15 }
  0x8e   :  { %v738_v6 = vsel %vm2753_vm12, %v726_v12, 0.0  ;;  %v370_v17 = vsel %vm3159_vm8, %v2572_v10, %v363_v62  ;;  %vm321_vm8 = vcmp.lt.s32.totalorder %v37_v28, 15  ;;  %vm3163_vm13 = vmmov %vm3162_vm2  ;;  %vm3166_vm12 = vcmask 31744   ;;  %v1882_v10 = vld.sshfl [vmem:[#allocation1 + $0x28] sm:$0xff pattern:$0x75316420] }
  0x8f   :  { %v382_v7 = vsel %vm2772_vm10, %v370_v17, 0.0  ;;  %2186 = vmatpush.msk.msrb.mxu2 %vm3161_vm4, %v738_v6  ;;  %v2792_v2 = vpop.permute.xlu2 %913  ;;  %vm2803_vm4 = vmand %vm2574_vm5, %vm324_vm11  ;;  %v1883_v28 = vld.sshfl [vmem:[#allocation1 + $0x30] sm:$0xff pattern:$0x75316420]  ;;  %v2207_v6 = vld [vmem:[%s3093_s1 + $0x20] sm:$0xff] }
  0x90   :  { %2179 = vmatpush.msk.msra.mxu3 %vm3162_vm2, %v382_v7  ;;  %v3165_v47 = vsel %vm2803_vm4, 4294967295, %v3164_v47  ;;  %vm2815_vm2 = vmand %vm2647_vm9, %vm321_vm8 }
  0x91   :  { %2178 = vmatmul.msk.f32.vlgmr.msra.gmra.mxu2 %vm3166_vm12, %v2677_v54  ;;  %v3169_v40 = vsel %vm2815_vm2, 4294967295, %v3168_v40  ;;  %vm3170_vm11 = vmmov %vm3166_vm12 }
  0x92   :  { %2188 = vmatpush.msk.msrb.mxu3 %vm3163_vm13, %v739_v63  ;;  %1887 = vrot.lane.b32.xlu1 %v1879_v51, %s2324_s30  ;;  %vm3167_vm13 = vcmask 1039360   ;;  %vm2823_vm12 = vmand %vm2531_vm14, %vm320_vm7  ;;  %vm3175_vm7 = vcmask 1043456  }
  0x93   :  { %1885 = vrot.lane.b32.xlu0 %v1878_v9, %s2324_s30  ;;  %v728_v23 = vsel %vm3167_vm13, %v2672_v30, %v2741_v1  ;;  %2180 = vmatmul.msk.f32.vlgmr.msra.gmra.mxu3 %vm3170_vm11, %v2677_v54  ;;  %v3172_v46 = vsel %vm2823_vm12, 4294967295, %v3171_v46  ;;  %vm3173_vm5 = vmmov %vm3167_vm13  ;;  %v3183_v54 = vmov 0 }
  0x94   :  { %v712_v18 = vpop.permute.xlu1 %711  ;;  %v740_v14 = vsel %vm2803_vm4, %v728_v23, 0.0  ;;  %vm3174_vm8 = vmmov %vm3173_vm5 }
  0x95   :  { %v725_v41 = vsel %vm3173_vm5, %v712_v18, %v714_v61  ;;  %v710_v20 = vpop.permute.xlu0 %709  ;;  %1893 = vrot.lane.b32.xlu2 %v1882_v10, %s2324_s30  ;;  %vm3176_vm5 = vmmov %vm3175_vm7 }
  0x96   :  { %v737_v21 = vsel %vm2815_vm2, %v725_v41, 0.0  ;;  %v724_v26 = vsel %vm3174_vm8, %v710_v20, %v712_v18  ;;  %vm3177_vm13 = vmmov %vm3170_vm11 }
  0x97   :  { %v736_v39 = vsel %vm2823_vm12, %v724_v26, 0.0  ;;  %2184 = vmatpush.msk.msrb.mxu1 %vm3175_vm7, %v737_v21  ;;  %v918_v52 = vpop.permute.xlu2 %917  ;;  %vm3178_vm11 = vmmov %vm3176_vm5  ;;  %vm919_vm7 = vcmask 924672  }
  0x98   :  { %2182 = vmatpush.msk.msrb.mxu0 %vm3176_vm5, %v736_v39  ;;  %2185 = vmatmul.msk.f32.vlgmr.msrb.gmra.mxu1 %vm3177_vm13, %v2181_v27  ;;  %vm3179_vm8 = vmmov %vm3177_vm13  ;;  %vm325_vm13 = vcmp.lt.s32.totalorder %v65_v50, 15 }
  0x99   :  { %2187 = vmatmul.msk.f32.vlgmr.msrb.gmra.mxu2 %vm3179_vm8, %v2181_v27  ;;  %vm3180_vm4 = vmmov %vm3179_vm8  ;;  %vm3186_vm8 = vcmask 1039360  }
  0x9a   :  { %2190 = vmatpush.msk.msra.mxu0 %vm3178_vm11, %v740_v14  ;;  %1897 = vrot.lane.b32.xlu1 %v1884_v42, %s2324_s30  ;;  %vm3181_vm2 = vmmov %vm3180_vm4 }
  0x9b   :  { %1895 = vrot.lane.b32.xlu0 %v1883_v28, %s2324_s30  ;;  %2183 = vmatmul.msk.f32.vlgmr.msrb.gmra.mxu0 %vm3180_vm4, %v2181_v27  ;;  %vm3182_vm4 = vmmov %vm3181_vm2  ;;  %v2220_v28 = vld [vmem:[%s3093_s1 + $0x28] sm:$0xff] }
  0x9c   :  { %v908_v15 = vpop.permute.xlu1 %907  ;;  %2189 = vmatmul.msk.f32.vlgmr.msrb.gmra.mxu3 %vm3181_vm2, %v2181_v27  ;;  %vm2860_vm2 = vmand %vm2679_vm6, %vm325_vm13 }
  0x9d   :  { %v906_v29 = vpop.permute.xlu0 %905  ;;  %v3184_v54 = vsel %vm2860_vm2, 4294967295, %v3183_v54  ;;  %vm3185_vm11 = vmmov %vm3182_vm4 }
  0x9e   :  { %v920_v37 = vsel %vm919_vm7, %v906_v29, %v908_v15  ;;  %vm3187_vm13 = vmmov %vm3176_vm5 }
  0x9f   :  { %v932_v59 = vsel %vm2701_vm1, %v920_v37, 0.0  ;;  %v1102_v30 = vpop.permute.xlu2 %1101  ;;  %vm3190_vm1 = vnez %v3147_v16 }
  0xa0   :  { %2195 = vmatpush.msk.msra.mxu2 %vm3176_vm5, %v932_v59 }
  0xa1   :  { %2196 = vmatmul.msk.f32.vlgmr.msra.gmra.mxu2 %vm3182_vm4, %v2194_v11 }
  0xa3   :  { %2191 = vmatmul.msk.f32.vlgmr.msra.gmra.mxu0 %vm3185_vm11, %v2181_v27  ;;  %vm3188_vm11 = vmmov %vm3182_vm4 }
  0xa4   :  { %v722_v33 = vpop.permute.xlu1 %721 }
  0xa5   :  { %v729_v38 = vsel %vm3186_vm8, %v2741_v1, %v722_v33  ;;  %v910_v8 = vpop.permute.xlu0 %909  ;;  %vm3189_vm8 = vnez %v3137_v24 }
  0xa6   :  { %v741_v49 = vsel %vm2860_vm2, %v729_v38, 0.0  ;;  %v921_v36 = vsel %vm919_vm7, %v908_v15, %v910_v8  ;;  %vm3120_vm2 = vcmask 916480  }
  0xa7   :  { %v933_v3 = vsel %vm2715_vm15, %v921_v36, 0.0  ;;  %2192 = vmatpush.msk.msra.mxu1 %vm3176_vm5, %v741_v49  ;;  %v1298_v50 = vpop.permute.xlu2 %1297  ;;  %vm3191_vm5 = vnez %v3143_v32 }
  0xa8   :  { %2197 = vmatpush.msk.msra.mxu3 %vm3187_vm13, %v933_v3  ;;  %2193 = vmatmul.msk.f32.vlgmr.msra.gmra.mxu1 %vm3182_vm4, %v2181_v27  ;;  %vm3192_vm4 = vmmov %vm3187_vm13 }
  0xa9   :  { %2198 = vmatmul.msk.f32.vlgmr.msra.gmra.mxu3 %vm3188_vm11, %v2194_v11  ;;  %vm3193_vm11 = vmmov %vm3192_vm4 }
  0xac   :  { %v912_v4 = vpop.permute.xlu1 %911 }
  0xad   :  { %v922_v55 = vsel %vm919_vm7, %v910_v8, %v912_v4  ;;  %v923_v57 = vsel %vm919_vm7, %v912_v4, %v2792_v2  ;;  %v916_v58 = vpop.permute.xlu0 %915 }
  0xae   :  { %v934_v53 = vsel %vm3189_vm8, %v922_v55, 0.0  ;;  %v935_v13 = vsel %vm3190_vm1, %v923_v57, 0.0  ;;  %v924_v56 = vsel %vm919_vm7, %v2792_v2, %v916_v58  ;;  %v925_v1 = vsel %vm919_vm7, %v916_v58, %v918_v52  ;;  %vm3194_vm1 = vmmov %vm3192_vm4 }
  0xaf   :  { %v936_v35 = vsel %vm3191_vm5, %v924_v56, 0.0  ;;  %v937_v48 = vsel %vm2772_vm10, %v925_v1, 0.0  ;;  %2199 = vmatpush.msk.msrb.mxu0 %vm3187_vm13, %v934_v53  ;;  %2201 = vmatpush.msk.msrb.mxu1 %vm3192_vm4, %v935_v13  ;;  %v2892_v61 = vpop.permute.xlu2 %1301  ;;  %vm3195_vm8 = vcmask 31744   ;;  %vm3202_vm13 = vmmov %vm3194_vm1 }
  0xb0   :  { %2203 = vmatpush.msk.msrb.mxu2 %vm3193_vm11, %v936_v35  ;;  %2205 = vmatpush.msk.msrb.mxu3 %vm3194_vm1, %v937_v48  ;;  %vm3196_vm15 = vmmov %vm3195_vm8 }
  0xb1   :  { %2204 = vmatmul.msk.f32.vlgmr.msrb.gmra.mxu2 %vm3195_vm8, %v2194_v11  ;;  %2200 = vmatmul.msk.f32.vlgmr.msrb.gmra.mxu0 %vm3196_vm15, %v2194_v11  ;;  %vm3197_vm7 = vmmov %vm3195_vm8 }
  0xb2   :  { %2206 = vmatmul.msk.f32.vlgmr.msrb.gmra.mxu3 %vm3197_vm7, %v2194_v11  ;;  %vm3198_vm5 = vmmov %vm3197_vm7 }
  0xb3   :  { %2202 = vmatmul.msk.f32.vlgmr.msrb.gmra.mxu1 %vm3198_vm5, %v2194_v11  ;;  %vm3199_vm15 = vmmov %vm3198_vm5 }
  0xb4   :  { %v1108_v12 = vpop.permute.xlu1 %1107  ;;  %vm3200_vm8 = vmmov %vm3194_vm1 }
  0xb5   :  { %v1106_v62 = vpop.permute.xlu0 %1105  ;;  %vm3201_vm5 = vmmov %vm3194_vm1 }
  0xb6   :  { %v1118_v63 = vsel %vm3120_vm2, %v1106_v62, %v1108_v12  ;;  %vm3203_vm4 = vmmov %vm3197_vm7 }
  0xb7   :  { %v1130_v17 = vsel %vm2566_vm3, %v1118_v63, 0.0  ;;  %v1308_v7 = vpop.permute.xlu2 %1307  ;;  %vm3204_vm11 = vmmov %vm3203_vm4 }
  0xb8   :  { %2212 = vmatpush.msk.msra.mxu2 %vm3194_vm1, %v1130_v17  ;;  %vm3205_vm7 = vmmov %vm3203_vm4  ;;  %vm1311_vm1 = vcmask 908288  }
  0xb9   :  { %2213 = vmatmul.msk.f32.vlgmr.msra.gmra.mxu2 %vm3199_vm15, %v2207_v6  ;;  %vm3206_vm15 = vnez %v3133_v19 }
  0xbc   :  { %v1110_v51 = vpop.permute.xlu1 %1109 }
  0xbd   :  { %v1119_v2 = vsel %vm3120_vm2, %v1108_v12, %v1110_v51  ;;  %v1104_v9 = vpop.permute.xlu0 %1103 }
  0xbe   :  { %v1131_v10 = vsel %vm2619_vm0, %v1119_v2, 0.0  ;;  %v1116_v23 = vsel %vm3120_vm2, %v1102_v30, %v1104_v9  ;;  %v1117_v18 = vsel %vm3120_vm2, %v1104_v9, %v1106_v62  ;;  %v2233_v62 = vld [vmem:[%s3093_s1 + $0x30] sm:$0xff]  ;;  %v2246_v9 = vld [vmem:[%s3093_s1 + $0x38] sm:$0xff] }
  0xbf   :  { %v1128_v41 = vsel %vm2531_vm14, %v1116_v23, 0.0  ;;  %v1129_v20 = vsel %vm2647_vm9, %v1117_v18, 0.0  ;;  %2214 = vmatpush.msk.msra.mxu3 %vm3200_vm8, %v1131_v10  ;;  %v1498_v14 = vpop.permute.xlu2 %1497  ;;  %vm3207_vm8 = vnez %v3169_v40 }
  0xc0   :  { %2208 = vmatpush.msk.msra.mxu0 %vm3201_vm5, %v1128_v41  ;;  %2210 = vmatpush.msk.msra.mxu1 %vm3202_vm13, %v1129_v20  ;;  %vm3208_vm13 = vmmov %vm3201_vm5 }
  0xc1   :  { %2209 = vmatmul.msk.f32.vlgmr.msra.gmra.mxu0 %vm3203_vm4, %v2207_v6  ;;  %2211 = vmatmul.msk.f32.vlgmr.msra.gmra.mxu1 %vm3204_vm11, %v2207_v6  ;;  %vm3209_vm4 = vmmov %vm3201_vm5 }
  0xc2   :  { %2215 = vmatmul.msk.f32.vlgmr.msra.gmra.mxu3 %vm3205_vm7, %v2207_v6  ;;  %vm3210_vm11 = vmmov %vm3205_vm7 }
  0xc4   :  { %v1112_v21 = vpop.permute.xlu1 %1111 }
  0xc5   :  { %v1120_v26 = vsel %vm3120_vm2, %v1110_v51, %v1112_v21  ;;  %v1300_v39 = vpop.permute.xlu0 %1299  ;;  %vm3211_vm2 = vmmov %vm3205_vm7 }
  0xc6   :  { %v1132_v42 = vsel %vm3206_vm15, %v1120_v26, 0.0  ;;  %v1312_v27 = vsel %vm1311_vm1, %v1298_v50, %v1300_v39  ;;  %v1313_v52 = vsel %vm1311_vm1, %v1300_v39, %v2892_v61 }
  0xc7   :  { %v1324_v15 = vsel %vm2823_vm12, %v1312_v27, 0.0  ;;  %v1325_v29 = vsel %vm3207_vm8, %v1313_v52, 0.0  ;;  %2216 = vmatpush.msk.msrb.mxu0 %vm3201_vm5, %v1132_v42  ;;  %v1496_v37 = vpop.permute.xlu2 %1495  ;;  %vm3212_vm12 = vnez %v3165_v47  ;;  %vm3213_vm8 = vcmask 916480   ;;  %vm3214_vm5 = vmmov %vm3209_vm4 }
  0xc8   :  { %2221 = vmatpush.msk.msrb.mxu2 %vm3208_vm13, %v1324_v15  ;;  %2223 = vmatpush.msk.msrb.mxu3 %vm3209_vm4, %v1325_v29  ;;  %vm3215_vm13 = vmmov %vm3209_vm4 }
  0xc9   :  { %2217 = vmatmul.msk.f32.vlgmr.msrb.gmra.mxu0 %vm3210_vm11, %v2207_v6  ;;  %2222 = vmatmul.msk.f32.vlgmr.msrb.gmra.mxu2 %vm3205_vm7, %v2220_v28  ;;  %vm3216_vm4 = vmmov %vm3211_vm2  ;;  %vm3219_vm7 = vnez %v3153_v45 }
  0xca   :  { %2224 = vmatmul.msk.f32.vlgmr.msrb.gmra.mxu3 %vm3211_vm2, %v2220_v28  ;;  %vm3217_vm11 = vmmov %vm3211_vm2  ;;  %vm3122_vm2 = vcmask 793600  }
  0xcb   :  { %v1509_v3 = vsel %vm3122_vm2, %v1496_v37, %v1498_v14 }
  0xcc   :  { %v1306_v59 = vpop.permute.xlu1 %1305 }
  0xcd   :  { %v1316_v11 = vsel %vm1311_vm1, %v1306_v59, %v1308_v7  ;;  %v1114_v30 = vpop.permute.xlu0 %1113 }
  0xce   :  { %v1328_v33 = vsel %vm3212_vm12, %v1316_v11, 0.0  ;;  %v1121_v38 = vsel %vm3213_vm8, %v1112_v21, %v1114_v30  ;;  %vm3218_vm8 = vnez %v3184_v54 }
  0xcf   :  { %v1133_v8 = vsel %vm2679_vm6, %v1121_v38, 0.0  ;;  %2229 = vmatpush.msk.msra.mxu2 %vm3214_vm5, %v1328_v33  ;;  %v1692_v49 = vpop.permute.xlu2 %1691  ;;  %vm3220_vm5 = vnez %v3156_v60 }
  0xd0   :  { %2218 = vmatpush.msk.msrb.mxu1 %vm3215_vm13, %v1133_v8  ;;  %vm3221_vm13 = vnez %v3149_v22 }
  0xd1   :  { %2219 = vmatmul.msk.f32.vlgmr.msrb.gmra.mxu1 %vm3216_vm4, %v2207_v6  ;;  %2230 = vmatmul.msk.f32.vlgmr.msra.gmra.mxu2 %vm3217_vm11, %v2220_v28  ;;  %v1521_v56 = vsel %vm3221_vm13, %v1509_v3, 0.0  ;;  %vm3222_vm4 = vcmask 1043456   ;;  %v2259_v3 = vld [vmem:[%s3093_s1 + $0x40] sm:$0xff] }
  0xd2   :  { %vm3223_vm11 = vmmov %vm3222_vm4 }
  0xd3   :  { %vm3224_vm2 = vmmov %vm3222_vm4 }
  0xd4   :  { %v1310_v36 = vpop.permute.xlu1 %1309  ;;  %vm3228_vm6 = vmmov %vm3224_vm2 }
  0xd5   :  { %v1317_v50 = vsel %vm1311_vm1, %v1308_v7, %v1310_v36  ;;  %v1304_v4 = vpop.permute.xlu0 %1303 }
  0xd6   :  { %v1329_v55 = vsel %vm3218_vm8, %v1317_v50, 0.0  ;;  %v1314_v57 = vsel %vm1311_vm1, %v2892_v61, %v1304_v4  ;;  %v1315_v58 = vsel %vm1311_vm1, %v1304_v4, %v1306_v59  ;;  %vm3225_vm8 = vcmask 31744  }
  0xd7   :  { %v1326_v53 = vsel %vm3219_vm7, %v1314_v57, 0.0  ;;  %v1327_v13 = vsel %vm3220_vm5, %v1315_v58, 0.0  ;;  %2231 = vmatpush.msk.msra.mxu3 %vm3222_vm4, %v1329_v55  ;;  %vm3226_vm12 = vmmov %vm3225_vm8  ;;  %v1506_v1 = vpop.permute.xlu2 %1505  ;;  %vm3229_vm5 = vcmask 793600   ;;  %vm3231_vm4 = vnez %v3145_v34 }
  0xd8   :  { %2225 = vmatpush.msk.msra.mxu0 %vm3223_vm11, %v1326_v53  ;;  %2227 = vmatpush.msk.msra.mxu1 %vm3224_vm2, %v1327_v13  ;;  %vm3227_vm1 = vmmov %vm3225_vm8 }
  0xd9   :  { %2226 = vmatmul.msk.f32.vlgmr.msra.gmra.mxu0 %vm3225_vm8, %v2220_v28  ;;  %2228 = vmatmul.msk.f32.vlgmr.msra.gmra.mxu1 %vm3226_vm12, %v2220_v28  ;;  %vm3230_vm13 = vmmov %vm3229_vm5  ;;  %vm3232_vm12 = vnez %v3137_v24 }
  0xda   :  { %2232 = vmatmul.msk.f32.vlgmr.msra.gmra.mxu3 %vm3227_vm1, %v2220_v28  ;;  %2236 = vmatpush.msk.msrb.mxu1 %vm3228_vm6, %v1521_v56  ;;  %vm3233_vm6 = vmmov %vm3224_vm2 }
  0xdb   :  { %vm3234_vm8 = vmmov %vm3227_vm1 }
  0xdc   :  { %v1494_v35 = vpop.permute.xlu1 %1493  ;;  %vm3235_vm11 = vmmov %vm3227_vm1 }
  0xdd   :  { %v1500_v48 = vpop.permute.xlu0 %1499  ;;  %v1508_v22 = vsel %vm3229_vm5, %v1494_v35, %v1496_v37  ;;  %vm3236_vm5 = vmmov %vm3227_vm1  ;;  %vm1703_vm1 = vcmask 785408   ;;  %v2998_v10 = vpop.f32.mrf.mxu0 }
  0xde   :  { %v1510_v61 = vsel %vm3230_vm13, %v1498_v14, %v1500_v48  ;;  %v1520_v12 = vsel %vm3231_vm4, %v1508_v22, 0.0  ;;  %vm3237_vm4 = vnez %v3147_v16 }
  0xdf   :  { %v1522_v63 = vsel %vm3232_vm12, %v1510_v61, 0.0  ;;  %2234 = vmatpush.msk.msrb.mxu0 %vm3224_vm2, %v1520_v12  ;;  %v1696_v7 = vpop.permute.xlu2 %1695  ;;  %vm3238_vm12 = vmmov %vm3224_vm2 }
  0xe0   :  { %2238 = vmatpush.msk.msrb.mxu2 %vm3233_vm6, %v1522_v63  ;;  %vm3239_vm6 = vmmov %vm3236_vm5 }
  0xe1   :  { %2235 = vmatmul.msk.f32.vlgmr.msrb.gmra.mxu0 %vm3234_vm8, %v2233_v62  ;;  %2237 = vmatmul.msk.f32.vlgmr.msrb.gmra.mxu1 %vm3235_vm11, %v2233_v62  ;;  %vm3240_vm8 = vmmov %vm3236_vm5 }
  0xe2   :  { %2239 = vmatmul.msk.f32.vlgmr.msrb.gmra.mxu2 %vm3236_vm5, %v2233_v62  ;;  %vm3242_vm11 = vmmov %vm3230_vm13  ;;  %vm3243_vm5 = vnez %v3143_v32 }
  0xe3   :  { %v491_v59 = vpop.f32.mrf.mxu2 }
  0xe4   :  { %v1690_v34 = vpop.permute.xlu1 %1689 }
  0xe5   :  { %v1502_v6 = vpop.permute.xlu0 %1501  ;;  %v1704_v17 = vsel %vm1703_vm1, %v1690_v34, %v1692_v49  ;;  %v531_v25 = vpop.f32.mrf.mxu0 }
  0xe6   :  { %v1511_v51 = vsel %vm3230_vm13, %v1500_v48, %v1502_v6  ;;  %v1716_v24 = vsel %vm2531_vm14, %v1704_v17, 0.0  ;;  %vm3241_vm14 = vmmov %vm3230_vm13 }
  0xe7   :  { %v1523_v2 = vsel %vm3237_vm4, %v1511_v51, 0.0  ;;  %2247 = vmatpush.msk.msra.mxu2 %vm3238_vm12, %v1716_v24  ;;  %vm3244_vm13 = vmmov %vm3224_vm2  ;;  %v1892_v42 = vpop.permute.xlu2 %1891 }
  0xe8   :  { %2240 = vmatpush.msk.msrb.mxu3 %vm3224_vm2, %v1523_v2  ;;  %vm3245_vm4 = vmmov %vm3224_vm2 }
  0xe9   :  { %2241 = vmatmul.msk.f32.vlgmr.msrb.gmra.mxu3 %vm3239_vm6, %v2233_v62  ;;  %vm3246_vm12 = vmmov %vm3224_vm2 }
  0xea   :  { %2248 = vmatmul.msk.f32.vlgmr.msra.gmra.mxu2 %vm3240_vm8, %v2246_v9  ;;  %vm3247_vm2 = vmmov %vm3239_vm6 }
  0xeb   :  { %vm3248_vm6 = vmmov %vm3247_vm2 }
  0xec   :  { %v1694_v23 = vpop.permute.xlu1 %1693  ;;  %vm3250_vm8 = vmmov %vm3245_vm4 }
  0xed   :  { %v1504_v5 = vpop.permute.xlu0 %1503  ;;  %v1705_v18 = vsel %vm1703_vm1, %v1692_v49, %v1694_v23  ;;  %v1706_v16 = vsel %vm1703_vm1, %v1694_v23, %v1696_v7 }
  0xee   :  { %v1512_v41 = vsel %vm3241_vm14, %v1502_v6, %v1504_v5  ;;  %v1513_v20 = vsel %vm3242_vm11, %v1504_v5, %v1506_v1  ;;  %v1717_v14 = vsel %vm2647_vm9, %v1705_v18, 0.0  ;;  %v1718_v39 = vsel %vm2566_vm3, %v1706_v16, 0.0  ;;  %vm3249_vm9 = vmmov %vm3247_vm2 }
  0xef   :  { %v1524_v21 = vsel %vm3243_vm5, %v1512_v41, 0.0  ;;  %v1525_v26 = vsel %vm2772_vm10, %v1513_v20, 0.0  ;;  %2249 = vmatpush.msk.msra.mxu3 %vm3244_vm13, %v1717_v14  ;;  %vm3251_vm3 = vmmov %vm3245_vm4  ;;  %vm1899_vm5 = vcmask 777216   ;;  %v1894_v15 = vpop.permute.xlu2 %1893 }
  0xf0   :  { %2242 = vmatpush.msk.msra.mxu0 %vm3245_vm4, %v1524_v21  ;;  %2244 = vmatpush.msk.msra.mxu1 %vm3246_vm12, %v1525_v26  ;;  %vm3252_vm10 = vmmov %vm3251_vm3  ;;  %v1903_v37 = vsel %vm1899_vm5, %v1892_v42, %v1894_v15 }
  0xf1   :  { %2243 = vmatmul.msk.f32.vlgmr.msra.gmra.mxu0 %vm3247_vm2, %v2233_v62  ;;  %2245 = vmatmul.msk.f32.vlgmr.msra.gmra.mxu1 %vm3248_vm6, %v2233_v62  ;;  %vm3253_vm14 = vmmov %vm3247_vm2  ;;  %vm3263_vm6 = vnez %v3169_v40 }
  0xf2   :  { %2250 = vmatmul.msk.f32.vlgmr.msra.gmra.mxu3 %vm3249_vm9, %v2246_v9  ;;  %2251 = vmatpush.msk.msrb.mxu0 %vm3250_vm8, %v1718_v39  ;;  %vm3254_vm11 = vmmov %vm3247_vm2  ;;  %vm3264_vm9 = vnez %v3172_v46 }
  0xf3   :  { %vm3255_vm13 = vmmov %vm3247_vm2 }
  0xf4   :  { %v1700_v32 = vpop.permute.xlu1 %1699  ;;  %vm3258_vm4 = vmmov %vm3251_vm3 }
  0xf5   :  { %v1698_v0 = vpop.permute.xlu0 %1697  ;;  %vm3259_vm12 = vmmov %vm3251_vm3 }
  0xf6   :  { %v1707_v43 = vsel %vm1703_vm1, %v1696_v7, %v1698_v0  ;;  %v1708_v27 = vsel %vm1703_vm1, %v1698_v0, %v1700_v32  ;;  %vm3265_vm8 = vmmov %vm3251_vm3 }
  0xf7   :  { %v1719_v52 = vsel %vm2619_vm0, %v1707_v43, 0.0  ;;  %v1720_v28 = vsel %vm3206_vm15, %v1708_v27, 0.0  ;;  %vm3256_vm0 = vnez %v3141_v31  ;;  %vm3257_vm15 = vnez %v3156_v60 }
  0xf8   :  { %2253 = vmatpush.msk.msrb.mxu1 %vm3251_vm3, %v1719_v52  ;;  %2255 = vmatpush.msk.msrb.mxu2 %vm3252_vm10, %v1720_v28  ;;  %v1915_v36 = vsel %vm3257_vm15, %v1903_v37, 0.0  ;;  %v511_v45 = vpop.f32.mrf.mxu3  ;;  %vm3271_vm15 = vmmov %vm3251_vm3 }
  0xf9   :  { %2252 = vmatmul.msk.f32.vlgmr.msrb.gmra.mxu0 %vm3253_vm14, %v2246_v9  ;;  %2254 = vmatmul.msk.f32.vlgmr.msrb.gmra.mxu1 %vm3254_vm11, %v2246_v9 }
  0xfa   :  { %2256 = vmatmul.msk.f32.vlgmr.msrb.gmra.mxu2 %vm3255_vm13, %v2246_v9  ;;  %v471_v29 = vpop.f32.mrf.mxu1  ;;  %vm3269_vm13 = vnez %v3165_v47 }
  0xfc   :  { %v1890_v44 = vpop.permute.xlu1 %1889 }
  0xfd   :  { %v1702_v11 = vpop.permute.xlu0 %1701  ;;  %v1902_v19 = vsel %vm1899_vm5, %v1890_v44, %v1892_v42  ;;  %v632_v30 = vpop.f32.mrf.mxu0 }
  0xfe   :  { %v1709_v33 = vsel %vm1703_vm1, %v1700_v32, %v1702_v11  ;;  %v1914_v38 = vsel %vm3219_vm7, %v1902_v19, 0.0  ;;  %v3036_v8 = vadd.f32 %v632_v30, %v491_v59  ;;  %vm3260_vm1 = vmmov %vm3247_vm2 }
  0xff   :  { %v1721_v49 = vsel %vm3256_vm0, %v1709_v33, 0.0  ;;  %2264 = vmatpush.msk.msra.mxu2 %vm3258_vm4, %v1914_v38  ;;  %vm3261_vm2 = vmmov %vm3260_vm1  ;;  %vm3270_vm0 = vnez %v3184_v54 }
 0x100   :  { %2257 = vmatpush.msk.msrb.mxu3 %vm3259_vm12, %v1721_v49  ;;  %vm3262_vm7 = vmmov %vm3251_vm3 }
 0x101   :  { %2258 = vmatmul.msk.f32.vlgmr.msrb.gmra.mxu3 %vm3260_vm1, %v2246_v9  ;;  %vm3266_vm10 = vmmov %vm3260_vm1 }
 0x102   :  { %2265 = vmatmul.msk.f32.vlgmr.msra.gmra.mxu2 %vm3261_vm2, %v2259_v3  ;;  %2266 = vmatpush.msk.msra.mxu3 %vm3262_vm7, %v1915_v36  ;;  %v551_v31 = vpop.f32.mrf.mxu1  ;;  %vm3267_vm14 = vmmov %vm3260_vm1 }
 0x103   :  { %vm3268_vm11 = vmmov %vm3260_vm1 }
 0x104   :  { %v1888_v50 = vpop.permute.xlu1 %1887  ;;  %vm3272_vm4 = vmmov %vm3251_vm3 }
 0x105   :  { %v1901_v60 = vsel %vm1899_vm5, %v1888_v50, %v1890_v44  ;;  %v1886_v4 = vpop.permute.xlu0 %1885  ;;  %vm3273_vm12 = vmmov %vm3260_vm1 }
 0x106   :  { %v1913_v55 = vsel %vm3263_vm6, %v1901_v60, 0.0  ;;  %v1900_v57 = vsel %vm1899_vm5, %v1886_v4, %v1888_v50 }
 0x107   :  { %v1912_v58 = vsel %vm3264_vm9, %v1900_v57, 0.0  ;;  %2262 = vmatpush.msk.msra.mxu1 %vm3265_vm8, %v1913_v55 }
 0x108   :  { %2260 = vmatpush.msk.msra.mxu0 %vm3251_vm3, %v1912_v58  ;;  %2263 = vmatmul.msk.f32.vlgmr.msra.gmra.mxu1 %vm3266_vm10, %v2259_v3 }
 0x109   :  { %2261 = vmatmul.msk.f32.vlgmr.msra.gmra.mxu0 %vm3267_vm14, %v2259_v3  ;;  %2267 = vmatmul.msk.f32.vlgmr.msra.gmra.mxu3 %vm3268_vm11, %v2259_v3 }
 0x10a   :  { %v652_v53 = vpop.f32.mrf.mxu1 }
 0x10b   :  { %v653_v40 = vadd.f32 %v652_v53, %v511_v45 }
 0x10c   :  { %v1898_v13 = vpop.permute.xlu1 %1897  ;;  %v612_v56 = vpop.f32.mrf.mxu3 }
 0x10d   :  { %v1896_v1 = vpop.permute.xlu0 %1895  ;;  %v592_v35 = vpop.f32.mrf.mxu2  ;;  %v613_v48 = vadd.f32 %v612_v56, %v471_v29 }
 0x10e   :  { %v1904_v46 = vsel %vm1899_vm5, %v1894_v15, %v1896_v1  ;;  %v1905_v22 = vsel %vm1899_vm5, %v1896_v1, %v1898_v13  ;;  %v593_v61 = vadd.f32 %v592_v35, %v2998_v10 }
 0x10f   :  { %v1916_v12 = vsel %vm3269_vm13, %v1904_v46, 0.0  ;;  %v1917_v62 = vsel %vm3270_vm0, %v1905_v22, 0.0 }
 0x110   :  { %2268 = vmatpush.msk.msrb.mxu0 %vm3271_vm15, %v1916_v12  ;;  %2270 = vmatpush.msk.msrb.mxu1 %vm3272_vm4, %v1917_v62 }
 0x111   :  { %2269 = vmatmul.msk.f32.vlgmr.msrb.gmra.mxu0 %vm3273_vm12, %v2259_v3  ;;  %2271 = vmatmul.msk.f32.vlgmr.msrb.gmra.mxu1 %vm3260_vm1, %v2259_v3 }
 0x115   :  { %v672_v63 = vpop.f32.mrf.mxu2  ;;  %v802_v7 = vpop.f32.mrf.mxu1 }
 0x116   :  { %v673_v34 = vadd.f32 %v672_v63, %v531_v25  ;;  %v692_v6 = vpop.f32.mrf.mxu3  ;;  %v886_v11 = vadd.f32 %v802_v7, %v613_v48 }
 0x117   :  { %v693_v17 = vadd.f32 %v692_v6, %v551_v31 }
 0x118   :  { %v782_v51 = vpop.f32.mrf.mxu0 }
 0x119   :  { %v885_v19 = vadd.f32 %v782_v51, %v593_v61 }
 0x11d   :  { %v822_v24 = vpop.f32.mrf.mxu2 }
 0x11e   :  { %v887_v30 = vadd.f32 %v822_v24, %v3036_v8 }
 0x11f   :  { %v842_v47 = vpop.f32.mrf.mxu3 }
 0x120   :  { %v862_v9 = vpop.f32.mrf.mxu0  ;;  %v888_v60 = vadd.f32 %v842_v47, %v653_v40 }
 0x121   :  { %v889_v13 = vadd.f32 %v862_v9, %v673_v34 }
 0x125   :  { %v882_v2 = vpop.f32.mrf.mxu1  ;;  %v978_v54 = vpop.f32.mrf.mxu2 }
 0x126   :  { %v1081_v49 = vadd.f32 %v978_v54, %v885_v19  ;;  %v890_v58 = vadd.f32 %v882_v2, %v693_v17 }
 0x12c   :  { %v998_v10 = vpop.f32.mrf.mxu3 }
 0x12d   :  { %v1082_v33 = vadd.f32 %v998_v10, %v886_v11 }
 0x12e   :  { %v1018_v18 = vpop.f32.mrf.mxu0 }
 0x12f   :  { %v1083_v45 = vadd.f32 %v1018_v18, %v887_v30 }
 0x130   :  { %v1038_v5 = vpop.f32.mrf.mxu1 }
 0x131   :  { %v1084_v35 = vadd.f32 %v1038_v5, %v888_v60 }
 0x134   :  { %v1058_v23 = vpop.f32.mrf.mxu2 }
 0x135   :  { %v1078_v41 = vpop.f32.mrf.mxu3  ;;  %v1085_v8 = vadd.f32 %v1058_v23, %v889_v13 }
 0x136   :  { %v1086_v12 = vadd.f32 %v1078_v41, %v890_v58 }
 0x13c   :  { %v1214_v14 = vpop.f32.mrf.mxu2 }
 0x13d   :  { %v1279_v55 = vadd.f32 %v1214_v14, %v1083_v45 }
 0x13e   :  { %v1194_v16 = vpop.f32.mrf.mxu1  ;;  %v1174_v20 = vpop.f32.mrf.mxu0 }
 0x13f   :  { %v1278_v31 = vadd.f32 %v1194_v16, %v1082_v33  ;;  %v1277_v4 = vadd.f32 %v1174_v20, %v1081_v49 }
 0x145   :  { %v1234_v26 = vpop.f32.mrf.mxu3 }
 0x146   :  { %v1254_v42 = vpop.f32.mrf.mxu0  ;;  %v1280_v62 = vadd.f32 %v1234_v26, %v1084_v35 }
 0x147   :  { %v1281_v40 = vadd.f32 %v1254_v42, %v1085_v8 }
 0x14c   :  { %v1370_v39 = vpop.f32.mrf.mxu2 }
 0x14d   :  { %v1390_v32 = vpop.f32.mrf.mxu3  ;;  %v1473_v53 = vadd.f32 %v1370_v39, %v1277_v4 }
 0x14e   :  { %v1274_v21 = vpop.f32.mrf.mxu1  ;;  %v1474_v57 = vadd.f32 %v1390_v32, %v1278_v31 }
 0x14f   :  { %v1282_v17 = vadd.f32 %v1274_v21, %v1086_v12 }
 0x154   :  { %v1450_v43 = vpop.f32.mrf.mxu2 }
 0x155   :  { %v1477_v9 = vadd.f32 %v1450_v43, %v1281_v40 }
 0x156   :  { %v1430_v25 = vpop.f32.mrf.mxu1  ;;  %v1410_v0 = vpop.f32.mrf.mxu0 }
 0x157   :  { %v1475_v56 = vadd.f32 %v1410_v0, %v1279_v55  ;;  %v1476_v34 = vadd.f32 %v1430_v25, %v1280_v62 }
 0x15d   :  { %v1470_v27 = vpop.f32.mrf.mxu3 }
 0x15e   :  { %v1586_v52 = vpop.f32.mrf.mxu1  ;;  %v1566_v15 = vpop.f32.mrf.mxu0  ;;  %v1478_v23 = vadd.f32 %v1470_v27, %v1282_v17 }
 0x15f   :  { %v1670_v1 = vadd.f32 %v1586_v52, %v1474_v57  ;;  %v1669_v48 = vadd.f32 %v1566_v15, %v1473_v53 }
 0x165   :  { %v1606_v28 = vpop.f32.mrf.mxu2 }
 0x166   :  { %v1671_v46 = vadd.f32 %v1606_v28, %v1475_v56 }
 0x16c   :  { %v1626_v29 = vpop.f32.mrf.mxu3 }
 0x16d   :  { %v1762_v59 = vpop.f32.mrf.mxu2  ;;  %v1672_v5 = vadd.f32 %v1626_v29, %v1476_v34 }
 0x16e   :  { %v1666_v37 = vpop.f32.mrf.mxu1  ;;  %v1646_v44 = vpop.f32.mrf.mxu0  ;;  %v1865_v63 = vadd.f32 %v1762_v59, %v1669_v48 }
 0x16f   :  { %v1673_v41 = vadd.f32 %v1646_v44, %v1477_v9  ;;  %v1674_v20 = vadd.f32 %v1666_v37, %v1478_v23 }
 0x175   :  { %v1782_v38 = vpop.f32.mrf.mxu3 }
 0x176   :  { %v1822_v36 = vpop.f32.mrf.mxu1  ;;  %v1802_v50 = vpop.f32.mrf.mxu0  ;;  %v1866_v22 = vadd.f32 %v1782_v38, %v1670_v1  ;;  %v2103_v1 = vld [vmem:[%s3094_s2] sm:$0xff]  ;;  %s2326_s2 = smov [#allocation2]  }
 0x177   :  { %v1867_v51 = vadd.f32 %v1802_v50, %v1671_v46  ;;  %v1868_v14 = vadd.f32 %v1822_v36, %v1672_v5  ;;  %v2325_v46 = vmov 1   ;;  %s2142_s19 = sshll.u32 %s2326_s2, 4  ;;  %s2143_s19 = int_to_ptr.vmem [resolvable:$true] %s2142_s19 }
 0x178   :  { %2287 = vset.pattern.permute.xlu0 %v2325_v46 }
 0x17d   :  { %v1842_v3 = vpop.f32.mrf.mxu2 }
 0x17e   :  { %v1869_v42 = vadd.f32 %v1842_v3, %v1673_v41 }
 0x184   :  { %v1862_v61 = vpop.f32.mrf.mxu3 }
 0x185   :  { %v1998_v6 = vpop.f32.mrf.mxu2  ;;  %v1978_v7 = vpop.f32.mrf.mxu1  ;;  %v1870_v25 = vadd.f32 %v1862_v61, %v1674_v20 }
 0x186   :  { %v1958_v24 = vpop.f32.mrf.mxu0  ;;  %v3073_v47 = vadd.f32 %v1978_v7, %v1866_v22  ;;  %v2063_v54 = vadd.f32 %v1998_v6, %v1867_v51 }
 0x187   :  { %v3075_v2 = vadd.f32 %v1958_v24, %v1865_v63 }
 0x188   :  { %v2075_v10 = vmul.f32 %v3073_v47, %v3073_v47  ;;  %v2076_v26 = vmul.f32 %v2063_v54, %v2063_v54 }
 0x189   :  { %v2074_v18 = vmul.f32 %v3075_v2, %v3075_v2  ;;  %v2067_v16 = vadd.f32 %v3073_v47, %v3075_v2 }
 0x18b   :  { %v2080_v21 = vadd.f32 %v2075_v10, %v2074_v18  ;;  %v2068_v0 = vadd.f32 %v2067_v16, %v2063_v54 }
 0x18c   :  { %v2018_v39 = vpop.f32.mrf.mxu3 }
 0x18d   :  { %v2064_v32 = vadd.f32 %v2018_v39, %v1868_v14  ;;  %v2081_v27 = vadd.f32 %v2080_v21, %v2076_v26 }
 0x18e   :  { %v2038_v43 = vpop.f32.mrf.mxu0  ;;  %v2058_v52 = vpop.f32.mrf.mxu1 }
 0x18f   :  { %v2069_v28 = vadd.f32 %v2068_v0, %v2064_v32  ;;  %v2077_v15 = vmul.f32 %v2064_v32, %v2064_v32  ;;  %v2065_v29 = vadd.f32 %v2038_v43, %v1869_v42  ;;  %v2066_v59 = vadd.f32 %v2058_v52, %v1870_v25 }
 0x191   :  { %v2078_v11 = vmul.f32 %v2065_v29, %v2065_v29  ;;  %v2070_v19 = vadd.f32 %v2069_v28, %v2065_v29  ;;  %v2082_v30 = vadd.f32 %v2081_v27, %v2077_v15  ;;  %v2079_v44 = vmul.f32 %v2066_v59, %v2066_v59 }
 0x193   :  { %v2071_v37 = vadd.f32 %v2070_v19, %v2066_v59  ;;  %v2083_v33 = vadd.f32 %v2082_v30, %v2078_v11 }
 0x195   :  { %2072 = vadd.xlane.f32.xlu2 %v2071_v37  ;;  %v2084_v38 = vadd.f32 %v2083_v33, %v2079_v44 }
 0x197   :  { %2085 = vadd.xlane.f32.xlu0 %v2084_v38 }
 0x208   :  { %v2073_v49 = vpop.xlane.xlu2 %2072 }
 0x209   :  { %v2087_v36 = vmul.f32 0.001953125, %v2073_v49 }
 0x20a   :  { %v2086_v3 = vpop.xlane.xlu0 %2085 }
 0x20b   :  { %v2089_v45 = vmul.f32 %v2087_v36, %v2087_v36  ;;  %v2088_v31 = vmul.f32 0.001953125, %v2086_v3 }
 0x20d   :  { %v2090_v50 = vsub.f32 %v2088_v31, %v2089_v45 }
 0x20f   :  { %v2091_v60 = vmax.f32 %v2090_v50, 0.0 }
 0x211   :  { %v2092_v4 = vadd.f32 1e-05, %v2091_v60 }
 0x213   :  { %2288 = vrsqrt.f32 %v2092_v4  ;;  %vm2099_vm2 = vweird.f32 %v2092_v4 }
 0x219   :  { %v2289_v55 = vpop.eup %2288 }
 0x21a   :  { %v2094_v57 = vmul.f32 %v2289_v55, %v2092_v4  ;;  %vm2100_vm5 = vweird.f32 %v2289_v55 }
 0x21b   :  { %vm2101_vm7 = vmor %vm2099_vm2, %vm2100_vm5 }
 0x21c   :  { %v2095_v58 = vmul.f32 %v2289_v55, %v2094_v57 }
 0x21e   :  { %v2096_v53 = vmul.f32 0.5, %v2095_v58 }
 0x220   :  { %v2097_v13 = vsub.f32 1.5, %v2096_v53 }
 0x222   :  { %v2098_v56 = vmul.f32 %v2289_v55, %v2097_v13 }
 0x224   :  { %v2102_v35 = vsel %vm2101_vm7, %v2289_v55, %v2098_v56 }
 0x225   :  { %v2104_v48 = vmul.f32 %v2103_v1, %v2102_v35 }
 0x227   :  { %v2105_v8 = vmul.f32 %v2104_v48, %v2087_v36 }
 0x229   :  { %2107 = vrot.lane.b32.xlu1 %v2105_v8, %s2316_s20 }
 0x231   :  { %2113 = vperm.xlu1 %2285, %v2104_v48  }
 0x239   :  { %2286 = vset.pattern.permute.xlu1 %v2325_v46 }
 0x29b   :  { %v2108_v22 = vpop.permute.xlu1 %2107 }
 0x29c   :  { %v2110_v61 = vsub.f32 %v2103_v1, %v2108_v22 }
 0x29e   :  { %2122 = vperm.xlu1 %2286, %v2110_v61  }
 0x2a3   :  { %v2114_v12 = vpop.permute.xlu1 %2113 }
 0x2a4   :  { %v2116_v62 = vmul.f32 %v2114_v12, %v3075_v2  ;;  %v2117_v63 = vmul.f32 %v2114_v12, %v3073_v47  ;;  %v2118_v6 = vmul.f32 %v2114_v12, %v2064_v32  ;;  %v2119_v7 = vmul.f32 %v2114_v12, %v2065_v29 }
 0x310   :  { %v2123_v40 = vpop.permute.xlu1 %2122 }
 0x311   :  { %v2125_v51 = vadd.f32 %v2123_v40, %v2116_v62  ;;  %v2126_v24 = vadd.f32 %v2123_v40, %v2117_v63  ;;  %v2127_v17 = vadd.f32 %v2123_v40, %v2118_v6  ;;  %v2128_v34 = vadd.f32 %v2123_v40, %v2119_v7 }
 0x313   :  { %v2129_v9 = vmax.f32 %v2125_v51, 0.0  ;;  %v2130_v54 = vmax.f32 %v2126_v24, 0.0  ;;  %v2131_v10 = vmax.f32 %v2127_v17, 0.0  ;;  %v2132_v23 = vmax.f32 %v2128_v34, 0.0 }
 0x315   :  { %2133 = vst [vmem:[#allocation2] sm:$0xff] %v2129_v9 }
 0x316   :  { %2134 = vst [vmem:[#allocation2 + $0x8] sm:$0xff] %v2130_v54 }
 0x317   :  { %2136 = vst [vmem:[#allocation2 + $0x10] sm:$0xff] %v2131_v10 }
 0x318   :  { %2137 = vst [vmem:[#allocation2 + $0x18] sm:$0xff] %v2132_v23 }
 0x319   :  { %2150 = dma.vmem_to_hbm [thread:$0]  %s2143_s19, 512, %s2145_s21, [#allocation3], %s2327_s22, %s2327_s22, %s2328_s23  }
 0x31a   :  { %2314 = dma.done.wait [#allocation3], 512  }
 0x31b   :  { %2315 = vsyncadd [#allocation3], 4294966784 }
 0x31c   :  { %2155 = vsyncpa [#allocation3], 1 }

</bundles_post_ra>
